<compile_context>
chip_gen: v7x
topology: tpu7x:2x2x1
jax: 0.10.0
libtpu: 0.0.40
codegen_flags: <defaults>
</compile_context>

<pallas_src>
import functools

import jax
import jax.numpy as jnp
from jax.experimental import pallas as pl
from jax.experimental.pallas import tpu as pltpu


# ----------------------------------------------------------------------------
# Kernel 1: fused im2col 3D convolution + BatchNorm partial statistics.
# ----------------------------------------------------------------------------
def _conv3d_im2col_kernel(*refs, K, Hout, Wout, Cin):
    # refs = (x_kd0, ..., x_kd{K-1}, w, b, out, stats)
    #   x_kd : (1, 1, Hp, Wp, Cin)      bf16, padded input depth-slab for tap kd
    #   w    : (K^3*Cin, Cout)          bf16, rows ordered (kd, kh, kw, cin)
    #   b    : (1, Cout)                f32
    #   out  : (1, 1, Hout*Wout, Cout)  f32
    #   stats: (1, 1, 2, Cout)          f32  (row 0: sum, row 1: sum of squares)
    x_refs = refs[:K]
    w_ref, b_ref, o_ref, st_ref = refs[K:]

    # Build the im2col LHS once per tile: columns ordered (kd, kh, kw, cin).
    cols = []
    for x_ref in x_refs:                      # kd = 0 .. K-1
        xs = x_ref[0, 0]                      # (Hp, Wp, Cin)
        for kh in range(K):
            for kw in range(K):
                cols.append(xs[kh:kh + Hout, kw:kw + Wout, :])
    lhs = jnp.concatenate(cols, axis=-1)                  # (Hout, Wout, K^3*Cin)
    lhs = lhs.reshape(Hout * Wout, K * K * K * Cin)

    # Single MXU matmul, contraction = K^3*Cin, bf16 inputs, f32 accumulation.
    acc = jnp.dot(lhs, w_ref[...], preferred_element_type=jnp.float32)
    acc = acc + b_ref[...]                                # broadcast (1, Cout)
    o_ref[0, 0] = acc

    # Fused BatchNorm partial statistics (avoids re-reading conv_out from HBM).
    s = jnp.sum(acc, axis=0, keepdims=True)               # (1, Cout)
    ss = jnp.sum(acc * acc, axis=0, keepdims=True)        # (1, Cout)
    st_ref[0, 0] = jnp.concatenate([s, ss], axis=0)       # (2, Cout)


# ----------------------------------------------------------------------------
# Kernel 2: normalize + affine + leaky_relu on a lane-dense (Hout, Wout*Cout)
# view.  scale/shift already fold mean, inv_std, gamma, beta per channel.
# ----------------------------------------------------------------------------
def _bn_lrelu_kernel(x_ref, scale_ref, shift_ref, o_ref, *, neg_slope):
    x = x_ref[0, 0]                                       # (Hout, Wout*Cout) f32
    y = x * scale_ref[...] + shift_ref[...]               # (1, Wout*Cout) bcast
    o_ref[0, 0] = jnp.where(y > 0, y, neg_slope * y)


# ----------------------------------------------------------------------------
# Host-side wrapper (layout glue: transpose, pad, weight reorder, stat fold).
# ----------------------------------------------------------------------------
def conv_block_forward(x_ncdhw, conv_w, conv_b, gamma, beta,
                       *, eps=1e-5, neg_slope=0.01, padding=True):
    """ConvBlock forward.  x_ncdhw: (N, Cin, D, H, W).  conv_w: (Cout, Cin, K, K, K)."""
    N, Cin, D, H, W = x_ncdhw.shape
    Cout, _, K, _, _ = conv_w.shape
    pad = 1 if padding else 0
    Dp, Hp, Wp = D + 2 * pad, H + 2 * pad, W + 2 * pad
    Dout, Hout, Wout = Dp - K + 1, Hp - K + 1, Wp - K + 1

    # NCDHW -> NDHWC, zero-pad spatial dims, cast to bf16 for the MXU.
    x = jnp.transpose(x_ncdhw, (0, 2, 3, 4, 1))
    xp = jnp.pad(x, ((0, 0), (pad, pad), (pad, pad), (pad, pad), (0, 0)))
    xp = xp.astype(jnp.bfloat16)

    # (Cout, Cin, Kd, Kh, Kw) -> (K^3*Cin, Cout), rows ordered (kd, kh, kw, cin).
    w2 = jnp.transpose(conv_w, (2, 3, 4, 1, 0)).reshape(K * K * K * Cin, Cout)
    w2 = w2.astype(jnp.bfloat16)
    b2 = conv_b.reshape(1, Cout).astype(jnp.float32)

    conv_kernel = functools.partial(_conv3d_im2col_kernel,
                                    K=K, Hout=Hout, Wout=Wout, Cin=Cin)
    in_specs = [
        pl.BlockSpec((1, 1, Hp, Wp, Cin),
                     (lambda n, d, kd=kd: (n, d + kd, 0, 0, 0)))
        for kd in range(K)
    ]
    in_specs += [
        pl.BlockSpec((K * K * K * Cin, Cout), lambda n, d: (0, 0)),
        pl.BlockSpec((1, Cout), lambda n, d: (0, 0)),
    ]
    conv_out, stats = pl.pallas_call(
        conv_kernel,
        out_shape=(jax.ShapeDtypeStruct((N, Dout, Hout * Wout, Cout), jnp.float32),
                   jax.ShapeDtypeStruct((N, Dout, 2, Cout), jnp.float32)),
        grid=(N, Dout),
        in_specs=in_specs,
        out_specs=(pl.BlockSpec((1, 1, Hout * Wout, Cout), lambda n, d: (n, d, 0, 0)),
                   pl.BlockSpec((1, 1, 2, Cout), lambda n, d: (n, d, 0, 0))),
        compiler_params=pltpu.CompilerParams(
            dimension_semantics=("parallel", "parallel"),
            vmem_limit_bytes=32 * 1024 * 1024),
    )(*([xp] * K), w2, b2)

    # Finalize BatchNorm batch statistics (tiny O(N*D*Cout) reduction) and fold
    # mean / inv_std / gamma / beta into a single per-channel scale & shift.
    count = N * Dout * Hout * Wout
    sums = jnp.sum(stats[:, :, 0, :], axis=(0, 1))
    sumsq = jnp.sum(stats[:, :, 1, :], axis=(0, 1))
    mean = sums / count
    var = jnp.maximum(sumsq / count - mean * mean, 0.0)    # biased var (torch BN)
    inv_std = jax.lax.rsqrt(var + eps)
    scale = gamma.astype(jnp.float32) * inv_std
    shift = beta.astype(jnp.float32) - mean * scale
    # Conv-output lanes are (w, cout) fused -> replicate per-channel params W
    # times so they broadcast over the lane-dense last dimension.
    scale_l = jnp.tile(scale, Wout).reshape(1, Wout * Cout)
    shift_l = jnp.tile(shift, Wout).reshape(1, Wout * Cout)

    # Free row-major reshape to a lane-dense (N, Dout, Hout, Wout*Cout) view.
    xbn = conv_out.reshape(N, Dout, Hout, Wout * Cout)

    y = pl.pallas_call(
        functools.partial(_bn_lrelu_kernel, neg_slope=neg_slope),
        out_shape=jax.ShapeDtypeStruct((N, Dout, Hout, Wout * Cout), jnp.float32),
        grid=(N, Dout),
        in_specs=[
            pl.BlockSpec((1, 1, Hout, Wout * Cout), lambda n, d: (n, d, 0, 0)),
            pl.BlockSpec((1, Wout * Cout), lambda n, d: (0, 0)),
            pl.BlockSpec((1, Wout * Cout), lambda n, d: (0, 0)),
        ],
        out_specs=pl.BlockSpec((1, 1, Hout, Wout * Cout), lambda n, d: (n, d, 0, 0)),
        compiler_params=pltpu.CompilerParams(
            dimension_semantics=("parallel", "parallel"),
            vmem_limit_bytes=32 * 1024 * 1024),
    )(xbn, scale_l, shift_l)

    # Back to PyTorch's NCDHW layout.
    y = y.reshape(N, Dout, Hout, Wout, Cout)
    return jnp.transpose(y, (0, 4, 1, 2, 3))


# ----------------------------------------------------------------------------
# Pure-JAX reference (sanity check of the Pallas result).
# ----------------------------------------------------------------------------
def _reference(x_ncdhw, conv_w, conv_b, gamma, beta, eps=1e-5, neg_slope=0.01):
    Cout = conv_w.shape[0]
    y = jax.lax.conv_general_dilated(
        x_ncdhw.astype(jnp.float32), conv_w.astype(jnp.float32),
        window_strides=(1, 1, 1), padding=((1, 1), (1, 1), (1, 1)),
        dimension_numbers=("NCDHW", "OIDHW", "NCDHW"))
    y = y + conv_b.reshape(1, Cout, 1, 1, 1)
    mean = jnp.mean(y, axis=(0, 2, 3, 4), keepdims=True)
    var = jnp.mean((y - mean) ** 2, axis=(0, 2, 3, 4), keepdims=True)
    y = (y - mean) * jax.lax.rsqrt(var + eps)
    y = y * gamma.reshape(1, Cout, 1, 1, 1) + beta.reshape(1, Cout, 1, 1, 1)
    return jnp.where(y > 0, y, neg_slope * y)


if __name__ == "__main__":
    key = jax.random.PRNGKey(0)
    k_x, k_w, k_b = jax.random.split(key, 3)

    # Small shapes consistent with ConvBlock(channels_in=4, channels_out=8, kernel_size=3)
    N, Cin, Cout, K = 2, 4, 8, 3
    D = H = W = 8

    x = jax.random.normal(k_x, (N, Cin, D, H, W), dtype=jnp.float32)
    # Deterministic synthetic parameters (no checkpoint load).
    fan_in = Cin * K * K * K
    bound = 1.0 / (fan_in ** 0.5)
    conv_w = jax.random.uniform(k_w, (Cout, Cin, K, K, K),
                                minval=-bound, maxval=bound, dtype=jnp.float32)
    conv_b = jax.random.uniform(k_b, (Cout,), minval=-bound, maxval=bound,
                                dtype=jnp.float32)
    gamma = jnp.ones((Cout,), jnp.float32)   # BatchNorm3d default affine init
    beta = jnp.zeros((Cout,), jnp.float32)

    out = conv_block_forward(x, conv_w, conv_b, gamma, beta)
    out = jax.block_until_ready(out)

    ref = jax.block_until_ready(_reference(x, conv_w, conv_b, gamma, beta))
    assert out.shape == (N, Cout, D, H, W)
    assert jnp.allclose(out, ref, atol=1e-2, rtol=1e-2), float(
        jnp.max(jnp.abs(out - ref)))

    print("KERNEL_OK")
</pallas_src>

<mosaic_0001>
module attributes {stable_mosaic.version = 11 : i64} {
  func.func @_conv3d_im2col_kernel(%arg0: i32, %arg1: i32, %arg2: memref<1x1x10x10x4xbf16, #tpu.memory_space<vmem>>, %arg3: memref<1x1x10x10x4xbf16, #tpu.memory_space<vmem>>, %arg4: memref<1x1x10x10x4xbf16, #tpu.memory_space<vmem>>, %arg5: memref<108x8xbf16, #tpu.memory_space<vmem>>, %arg6: memref<1x8xf32, #tpu.memory_space<vmem>>, %arg7: memref<1x1x64x8xf32, #tpu.memory_space<vmem>>, %arg8: memref<1x1x2x8xf32, #tpu.memory_space<vmem>>) attributes {dimension_semantics = [#tpu.dimension_semantics<parallel>, #tpu.dimension_semantics<parallel>], iteration_bounds = array<i64: 2, 8>, scalar_prefetch = 0 : i64, scratch_operands = 0 : i64, tpu.core_type = #tpu.core_type<tc>, window_params = [{transform_indices = @transform_0, window_bounds = array<i64: 1, 1, 10, 10, 4>}, {transform_indices = @transform_1, window_bounds = array<i64: 1, 1, 10, 10, 4>}, {transform_indices = @transform_2, window_bounds = array<i64: 1, 1, 10, 10, 4>}, {pipeline_mode = #tpu.pipeline_mode<synchronous>, transform_indices = @transform_3, window_bounds = array<i64: 108, 8>}, {pipeline_mode = #tpu.pipeline_mode<synchronous>, transform_indices = @transform_4, window_bounds = array<i64: 1, 8>}, {transform_indices = @transform_5, window_bounds = array<i64: 1, 1, 64, 8>}, {transform_indices = @transform_6, window_bounds = array<i64: 1, 1, 2, 8>}]} {
    %c0 = arith.constant 0 : index
    %c0_0 = arith.constant 0 : index
    %c0_1 = arith.constant 0 : index
    %c0_2 = arith.constant 0 : index
    %c0_3 = arith.constant 0 : index
    %0 = vector.load %arg2[%c0, %c0_0, %c0_1, %c0_2, %c0_3] : memref<1x1x10x10x4xbf16, #tpu.memory_space<vmem>>, vector<1x1x10x10x4xbf16>
    %1 = vector.shape_cast %0 : vector<1x1x10x10x4xbf16> to vector<10x10x4xbf16>
    %2 = vector.extract_strided_slice %1 {offsets = [0, 0, 0], sizes = [8, 8, 4], strides = [1, 1, 1]} : vector<10x10x4xbf16> to vector<8x8x4xbf16>
    %3 = vector.extract_strided_slice %1 {offsets = [0, 1, 0], sizes = [8, 8, 4], strides = [1, 1, 1]} : vector<10x10x4xbf16> to vector<8x8x4xbf16>
    %4 = vector.extract_strided_slice %1 {offsets = [0, 2, 0], sizes = [8, 8, 4], strides = [1, 1, 1]} : vector<10x10x4xbf16> to vector<8x8x4xbf16>
    %5 = vector.extract_strided_slice %1 {offsets = [1, 0, 0], sizes = [8, 8, 4], strides = [1, 1, 1]} : vector<10x10x4xbf16> to vector<8x8x4xbf16>
    %6 = vector.extract_strided_slice %1 {offsets = [1, 1, 0], sizes = [8, 8, 4], strides = [1, 1, 1]} : vector<10x10x4xbf16> to vector<8x8x4xbf16>
    %7 = vector.extract_strided_slice %1 {offsets = [1, 2, 0], sizes = [8, 8, 4], strides = [1, 1, 1]} : vector<10x10x4xbf16> to vector<8x8x4xbf16>
    %8 = vector.extract_strided_slice %1 {offsets = [2, 0, 0], sizes = [8, 8, 4], strides = [1, 1, 1]} : vector<10x10x4xbf16> to vector<8x8x4xbf16>
    %9 = vector.extract_strided_slice %1 {offsets = [2, 1, 0], sizes = [8, 8, 4], strides = [1, 1, 1]} : vector<10x10x4xbf16> to vector<8x8x4xbf16>
    %10 = vector.extract_strided_slice %1 {offsets = [2, 2, 0], sizes = [8, 8, 4], strides = [1, 1, 1]} : vector<10x10x4xbf16> to vector<8x8x4xbf16>
    %c0_4 = arith.constant 0 : index
    %c0_5 = arith.constant 0 : index
    %c0_6 = arith.constant 0 : index
    %c0_7 = arith.constant 0 : index
    %c0_8 = arith.constant 0 : index
    %11 = vector.load %arg3[%c0_4, %c0_5, %c0_6, %c0_7, %c0_8] : memref<1x1x10x10x4xbf16, #tpu.memory_space<vmem>>, vector<1x1x10x10x4xbf16>
    %12 = vector.shape_cast %11 : vector<1x1x10x10x4xbf16> to vector<10x10x4xbf16>
    %13 = vector.extract_strided_slice %12 {offsets = [0, 0, 0], sizes = [8, 8, 4], strides = [1, 1, 1]} : vector<10x10x4xbf16> to vector<8x8x4xbf16>
    %14 = vector.extract_strided_slice %12 {offsets = [0, 1, 0], sizes = [8, 8, 4], strides = [1, 1, 1]} : vector<10x10x4xbf16> to vector<8x8x4xbf16>
    %15 = vector.extract_strided_slice %12 {offsets = [0, 2, 0], sizes = [8, 8, 4], strides = [1, 1, 1]} : vector<10x10x4xbf16> to vector<8x8x4xbf16>
    %16 = vector.extract_strided_slice %12 {offsets = [1, 0, 0], sizes = [8, 8, 4], strides = [1, 1, 1]} : vector<10x10x4xbf16> to vector<8x8x4xbf16>
    %17 = vector.extract_strided_slice %12 {offsets = [1, 1, 0], sizes = [8, 8, 4], strides = [1, 1, 1]} : vector<10x10x4xbf16> to vector<8x8x4xbf16>
    %18 = vector.extract_strided_slice %12 {offsets = [1, 2, 0], sizes = [8, 8, 4], strides = [1, 1, 1]} : vector<10x10x4xbf16> to vector<8x8x4xbf16>
    %19 = vector.extract_strided_slice %12 {offsets = [2, 0, 0], sizes = [8, 8, 4], strides = [1, 1, 1]} : vector<10x10x4xbf16> to vector<8x8x4xbf16>
    %20 = vector.extract_strided_slice %12 {offsets = [2, 1, 0], sizes = [8, 8, 4], strides = [1, 1, 1]} : vector<10x10x4xbf16> to vector<8x8x4xbf16>
    %21 = vector.extract_strided_slice %12 {offsets = [2, 2, 0], sizes = [8, 8, 4], strides = [1, 1, 1]} : vector<10x10x4xbf16> to vector<8x8x4xbf16>
    %c0_9 = arith.constant 0 : index
    %c0_10 = arith.constant 0 : index
    %c0_11 = arith.constant 0 : index
    %c0_12 = arith.constant 0 : index
    %c0_13 = arith.constant 0 : index
    %22 = vector.load %arg4[%c0_9, %c0_10, %c0_11, %c0_12, %c0_13] : memref<1x1x10x10x4xbf16, #tpu.memory_space<vmem>>, vector<1x1x10x10x4xbf16>
    %23 = vector.shape_cast %22 : vector<1x1x10x10x4xbf16> to vector<10x10x4xbf16>
    %24 = vector.extract_strided_slice %23 {offsets = [0, 0, 0], sizes = [8, 8, 4], strides = [1, 1, 1]} : vector<10x10x4xbf16> to vector<8x8x4xbf16>
    %25 = vector.extract_strided_slice %23 {offsets = [0, 1, 0], sizes = [8, 8, 4], strides = [1, 1, 1]} : vector<10x10x4xbf16> to vector<8x8x4xbf16>
    %26 = vector.extract_strided_slice %23 {offsets = [0, 2, 0], sizes = [8, 8, 4], strides = [1, 1, 1]} : vector<10x10x4xbf16> to vector<8x8x4xbf16>
    %27 = vector.extract_strided_slice %23 {offsets = [1, 0, 0], sizes = [8, 8, 4], strides = [1, 1, 1]} : vector<10x10x4xbf16> to vector<8x8x4xbf16>
    %28 = vector.extract_strided_slice %23 {offsets = [1, 1, 0], sizes = [8, 8, 4], strides = [1, 1, 1]} : vector<10x10x4xbf16> to vector<8x8x4xbf16>
    %29 = vector.extract_strided_slice %23 {offsets = [1, 2, 0], sizes = [8, 8, 4], strides = [1, 1, 1]} : vector<10x10x4xbf16> to vector<8x8x4xbf16>
    %30 = vector.extract_strided_slice %23 {offsets = [2, 0, 0], sizes = [8, 8, 4], strides = [1, 1, 1]} : vector<10x10x4xbf16> to vector<8x8x4xbf16>
    %31 = vector.extract_strided_slice %23 {offsets = [2, 1, 0], sizes = [8, 8, 4], strides = [1, 1, 1]} : vector<10x10x4xbf16> to vector<8x8x4xbf16>
    %32 = vector.extract_strided_slice %23 {offsets = [2, 2, 0], sizes = [8, 8, 4], strides = [1, 1, 1]} : vector<10x10x4xbf16> to vector<8x8x4xbf16>
    %33 = tpu.concatenate %2, %3, %4, %5, %6, %7, %8, %9, %10, %13, %14, %15, %16, %17, %18, %19 in 2 : vector<8x8x4xbf16>, vector<8x8x4xbf16>, vector<8x8x4xbf16>, vector<8x8x4xbf16>, vector<8x8x4xbf16>, vector<8x8x4xbf16>, vector<8x8x4xbf16>, vector<8x8x4xbf16>, vector<8x8x4xbf16>, vector<8x8x4xbf16>, vector<8x8x4xbf16>, vector<8x8x4xbf16>, vector<8x8x4xbf16>, vector<8x8x4xbf16>, vector<8x8x4xbf16>, vector<8x8x4xbf16> -> vector<8x8x64xbf16>
    %34 = tpu.concatenate %20, %21, %24, %25, %26, %27, %28, %29, %30, %31, %32 in 2 : vector<8x8x4xbf16>, vector<8x8x4xbf16>, vector<8x8x4xbf16>, vector<8x8x4xbf16>, vector<8x8x4xbf16>, vector<8x8x4xbf16>, vector<8x8x4xbf16>, vector<8x8x4xbf16>, vector<8x8x4xbf16>, vector<8x8x4xbf16>, vector<8x8x4xbf16> -> vector<8x8x44xbf16>
    %35 = tpu.concatenate %33, %34 in 2 : vector<8x8x64xbf16>, vector<8x8x44xbf16> -> vector<8x8x108xbf16>
    %36 = vector.shape_cast %35 : vector<8x8x108xbf16> to vector<64x108xbf16>
    %c0_14 = arith.constant 0 : index
    %c0_15 = arith.constant 0 : index
    %37 = vector.load %arg5[%c0_14, %c0_15] : memref<108x8xbf16, #tpu.memory_space<vmem>>, vector<108x8xbf16>
    %cst = arith.constant dense<0.000000e+00> : vector<64x8xf32>
    %38 = tpu.matmul %36, %37, %cst {dimension_numbers = #tpu.dot_dimension_numbers<[1], [0], [0], [1], [0, 0, 1, 1], [], []>} : vector<64x108xbf16>, vector<108x8xbf16>, vector<64x8xf32> -> vector<64x8xf32>
    %c0_16 = arith.constant 0 : index
    %c0_17 = arith.constant 0 : index
    %39 = vector.load %arg6[%c0_16, %c0_17] : memref<1x8xf32, #tpu.memory_space<vmem>>, vector<1x8xf32>
    %40 = vector.broadcast %39 : vector<1x8xf32> to vector<64x8xf32>
    %41 = arith.addf %38, %40 : vector<64x8xf32>
    %c0_18 = arith.constant 0 : index
    %c0_19 = arith.constant 0 : index
    %c0_20 = arith.constant 0 : index
    %c0_21 = arith.constant 0 : index
    %42 = vector.load %arg7[%c0_18, %c0_19, %c0_20, %c0_21] : memref<1x1x64x8xf32, #tpu.memory_space<vmem>>, vector<1x1x64x8xf32>
    %43 = vector.shape_cast %42 : vector<1x1x64x8xf32> to vector<64x8xf32>
    %44 = vector.shape_cast %41 : vector<64x8xf32> to vector<1x1x64x8xf32>
    tpu.vector_store %arg7[%c0_18, %c0_19, %c0_20, %c0_21], %44 {strides = array<i32>} : memref<1x1x64x8xf32, #tpu.memory_space<vmem>>, vector<1x1x64x8xf32>,
    %cst_22 = arith.constant dense<0.000000e+00> : vector<8xf32>
    %45 = vector.multi_reduction <add>, %41, %cst_22 [0] : vector<64x8xf32> to vector<8xf32>
    %46 = vector.shape_cast %45 : vector<8xf32> to vector<1x8xf32>
    %47 = arith.mulf %41, %41 : vector<64x8xf32>
    %cst_23 = arith.constant dense<0.000000e+00> : vector<8xf32>
    %48 = vector.multi_reduction <add>, %47, %cst_23 [0] : vector<64x8xf32> to vector<8xf32>
    %49 = vector.shape_cast %48 : vector<8xf32> to vector<1x8xf32>
    %50 = tpu.concatenate %46, %49 in 0 : vector<1x8xf32>, vector<1x8xf32> -> vector<2x8xf32>
    %c0_24 = arith.constant 0 : index
    %c0_25 = arith.constant 0 : index
    %c0_26 = arith.constant 0 : index
    %c0_27 = arith.constant 0 : index
    %51 = vector.load %arg8[%c0_24, %c0_25, %c0_26, %c0_27] : memref<1x1x2x8xf32, #tpu.memory_space<vmem>>, vector<1x1x2x8xf32>
    %52 = vector.shape_cast %51 : vector<1x1x2x8xf32> to vector<2x8xf32>
    %53 = vector.shape_cast %50 : vector<2x8xf32> to vector<1x1x2x8xf32>
    tpu.vector_store %arg8[%c0_24, %c0_25, %c0_26, %c0_27], %53 {strides = array<i32>} : memref<1x1x2x8xf32, #tpu.memory_space<vmem>>, vector<1x1x2x8xf32>,
    return
  }
  func.func @transform_0(%arg0: i32, %arg1: i32) -> (i32, i32, i32, i32, i32) {
    %c0_i32 = arith.constant 0 : i32
    %0 = arith.addi %arg1, %c0_i32 : i32
    %c0_i32_0 = arith.constant 0 : i32
    %c0_i32_1 = arith.constant 0 : i32
    %c0_i32_2 = arith.constant 0 : i32
    %c0_i32_3 = arith.constant 0 : i32
    return %arg0, %0, %c0_i32_0, %c0_i32_1, %c0_i32_2 : i32, i32, i32, i32, i32
  }
  func.func @transform_1(%arg0: i32, %arg1: i32) -> (i32, i32, i32, i32, i32) {
    %c1_i32 = arith.constant 1 : i32
    %0 = arith.addi %arg1, %c1_i32 : i32
    %c0_i32 = arith.constant 0 : i32
    %c0_i32_0 = arith.constant 0 : i32
    %c0_i32_1 = arith.constant 0 : i32
    %c0_i32_2 = arith.constant 0 : i32
    return %arg0, %0, %c0_i32, %c0_i32_0, %c0_i32_1 : i32, i32, i32, i32, i32
  }
  func.func @transform_2(%arg0: i32, %arg1: i32) -> (i32, i32, i32, i32, i32) {
    %c2_i32 = arith.constant 2 : i32
    %0 = arith.addi %arg1, %c2_i32 : i32
    %c0_i32 = arith.constant 0 : i32
    %c0_i32_0 = arith.constant 0 : i32
    %c0_i32_1 = arith.constant 0 : i32
    %c0_i32_2 = arith.constant 0 : i32
    return %arg0, %0, %c0_i32, %c0_i32_0, %c0_i32_1 : i32, i32, i32, i32, i32
  }
  func.func @transform_3(%arg0: i32, %arg1: i32) -> (i32, i32) {
    %c0_i32 = arith.constant 0 : i32
    %c0_i32_0 = arith.constant 0 : i32
    %c0_i32_1 = arith.constant 0 : i32
    return %c0_i32, %c0_i32_0 : i32, i32
  }
  func.func @transform_4(%arg0: i32, %arg1: i32) -> (i32, i32) {
    %c0_i32 = arith.constant 0 : i32
    %c0_i32_0 = arith.constant 0 : i32
    %c0_i32_1 = arith.constant 0 : i32
    return %c0_i32, %c0_i32_0 : i32, i32
  }
  func.func @transform_5(%arg0: i32, %arg1: i32) -> (i32, i32, i32, i32) {
    %c0_i32 = arith.constant 0 : i32
    %c0_i32_0 = arith.constant 0 : i32
    %c0_i32_1 = arith.constant 0 : i32
    return %arg0, %arg1, %c0_i32, %c0_i32_0 : i32, i32, i32, i32
  }
  func.func @transform_6(%arg0: i32, %arg1: i32) -> (i32, i32, i32, i32) {
    %c0_i32 = arith.constant 0 : i32
    %c0_i32_0 = arith.constant 0 : i32
    %c0_i32_1 = arith.constant 0 : i32
    return %arg0, %arg1, %c0_i32, %c0_i32_0 : i32, i32, i32, i32
  }
}

</mosaic_0001>

<bundles_post_ra>
// kernel: tpu_custom_call.1
= control target key start
LH: loop header
LB: loop body
LE: loop exit
PB: predicated region body
PF: predicated region fallthrough
CT: control target
= control target key end

     0   :  { %12 = vsyncpa [#allocation3], 0  ;;  %s4245_s0 = inlined_call_operand.vmem [shape: bf16[2,10,10,10,4], index: 0, kind: input, shape index: {}]   ;;  %s4246_s1 = inlined_call_operand.vmem [shape: bf16[2,10,10,10,4], index: 1, kind: input, shape index: {}]   ;;  %s4247_s2 = inlined_call_operand.vmem [shape: bf16[2,10,10,10,4], index: 2, kind: input, shape index: {}]   ;;  %s4248_s3 = inlined_call_operand.vmem [shape: bf16[108,8], index: 3, kind: input, shape index: {}]   ;;  %s4249_s4 = inlined_call_operand.vmem [shape: f32[1,8], index: 4, kind: input, shape index: {}]   ;;  %s4250_s5 = inlined_call_operand.vmem [shape: f32[2,8,64,8], index: 5, kind: output, shape index: {0}]   ;;  %s4251_s6 = inlined_call_operand.hbm [shape: f32[2,8,2,8], index: 6, kind: output, shape index: {1}]  }
   0x1   :  { %14 = vsyncpa [#allocation3 + $0x1], 0  ;;  %s2703_s21 = smov 0   ;;  %s2705_s22 = smov 0  }
   0x2   :  { %s2707_s23 = smov 0   ;;  %s2709_s24 = smov 0  }
   0x3   :  { %s2711_s25 = smov 0   ;;  %s2713_s26 = smov 0  }
   0x4   :  { %s2715_s27 = smov 0   ;;  %s2717_s28 = smov 0  }
   0x5 LB: > { %s2244_s29 = sadd.s32 4294967295, %s2649_s28   ;;  %s2245_s30 = sadd.s32 4294967294, %s2649_s28   ;;  %s2649_s28 = sphi %s2717_s28, %s20_s28   ;;  %s2645_s27 = sphi %s2715_s27, %s4440_s27   ;;  %s2641_s26 = sphi %s2713_s26, %s4439_s26   ;;  %s2637_s25 = sphi %s2711_s25, %s4438_s25   ;;  %s2633_s24 = sphi %s2709_s24, %s4437_s24   ;;  %s2629_s23 = sphi %s2707_s23, %s4436_s23   ;;  %s2625_s22 = sphi %s2705_s22, %s4435_s22   ;;  %s2621_s21 = sphi %s2703_s21, %s4434_s21  }
   0x6   : > { %s29_s7 = sadd.s32 1, %s2641_s26  ;;  %s32_s8 = sadd.s32 1, %s2645_s27 }
   0x7   : > { %p30_p0 = scmp.ge.s32.totalorder %s29_s7, 8  ;;  %p209_p1 = scmp.ne.s32.totalorder %s2629_s23, %s2625_s22 }
   0x8   : > { %p210_p2 = scmp.eq.s32.totalorder %s2244_s29, 15  ;;  %p215_p5 = scmp.ne.s32.totalorder %s2625_s22, %s2621_s21 }
   0x9   : > { %s4442_s7 = smov (%p30_p0, %s29_s7), 0  ;;  %s4444_s8 = smov (!%p30_p0, %s32_s8), %s2645_s27 }
   0xa   : > { %s195_s9 = ssub.s32 %s2641_s26, %s4442_s7  ;;  %p2754_p3 = por %p210_p2, %p209_p1 }
   0xb   : > { %p34_p4 = scmp.ge.s32.totalorder %s4444_s8, 2  ;;  %p216_p6 = scmp.eq.s32.totalorder %s2245_s30, 15 }
   0xc   : > { %p2248_p7 = scmp.ge.s32.totalorder %s2649_s28, 1  ;;  %p280_p9 = scmp.lt.s32.totalorder %s2649_s28, 17 }
   0xd   : > { %s4446_s8 = smov (%p34_p4, %s4444_s8), 0  ;;  %p2763_p8 = por %p216_p6, %p215_p5 }
   0xe   : > { %s194_s12 = ssub.s32 %s2645_s27, %s4446_s8  ;;  %s199_s13 = sadd.s32 1, %s2629_s23 }
   0xf   : > { %s196_s14 = sor.u32 %s195_s9, %s194_s12  ;;  %p281_p10 = pnand %p2248_p7, %p280_p9 }
  0x10   : > { %p197_p11 = scmp.eq.s32.totalorder %s196_s14, 0 }
  0x11   : > { %284 = sbr.rel (%p281_p10) target bundleno = 824 (0x338), region = 40 }
  0x12   : > { %s2772_s15 = scalar_select %p197_p11, %s2629_s23, %s199_s13  }
  0x18   : > { %p343_p12 = scmp.lt.s32.totalorder %s2637_s25, 1  ;;  %p345_p13 = scmp.lt.s32.totalorder %s2633_s24, 9  ;;  %vm952_vm0 = vcmask 31744   ;;  %vm994_vm1 = vcmask 97280   ;;  %vm977_vm2 = vcmask 64512   ;;  %vm1011_vm3 = vcmask 130048  }
  0x19   : > { %s352_s20 = sadd.s32 1, %s2633_s24  ;;  %s2652_s9 = smov 4   ;;  %vm1028_vm4 = vcmask 162816   ;;  %vm1045_vm5 = vcmask 195584   ;;  %vm1062_vm6 = vcmask 228352   ;;  %vm1079_vm7 = vcmask 261120  }
  0x1a   : > { %s2777_s16 = scalar_select %p343_p12, %s2637_s25, 1  ;;  %vm1096_vm8 = vcmask 293888   ;;  %vm1113_vm9 = vcmask 326656   ;;  %vm1921_vm10 = vcmask 1045504   ;;  %vm1130_vm11 = vcmask 359424  }
  0x1b   : > { %s346_s17 = scalar_select %p345_p13, %s2633_s24, 9  ;;  %vm1147_vm12 = vcmask 392192   ;;  %vm1164_vm13 = vcmask 424960   ;;  %vm1181_vm14 = vcmask 457728   ;;  %vm1198_vm15 = vcmask 490496  }
  0x1c   : > { %s2781_s18 = smul.u32 200, %s2777_s16  ;;  %p2785_p0 = scmp.lt.s32.totalorder %s352_s20, 9 }
  0x1d   : > { %s2385_s19 = smul.u32 20, %s346_s17  ;;  %s363_s17 = sadd.s32 2, %s2633_s24 }
  0x1e   : > { %p2827_p1 = scmp.lt.s32.totalorder %s363_s17, 9  ;;  %s4448_s20 = smov (!%p2785_p0, %s352_s20), 9 }
  0x1f   : > { %s349_s29 = sadd.s32 %s2781_s18, %s2385_s19  ;;  %p376_p2 = scmp.lt.s32.totalorder %s2633_s24, 7 }
  0x20   : > { %s2250_s30 = sshll.u32 %s349_s29, 2  ;;  %s2651_s29 = smov 8  }
  0x21   : > { %s2792_s14 = scalar_lea.vmem %s4245_s0, %s2250_s30  ;;  %s2387_s30 = smul.u32 20, %s4448_s20 }
  0x22   : > { %v2796_v0 = vld [vmem:[%s2792_s14 + $0x8] sm:$0xf]  ;;  %v387_v1 = vld [vmem:[%s2792_s14 + $0xc] sm:$0x1]  ;;  %v384_v2 = vld [vmem:[%s2792_s14] sm:$0xf] }
  0x23   : > { %v2801_v3 = vcombine.low %v2796_v0, %v387_v1  ;;  %v385_v4 = vld [vmem:[%s2792_s14 + $0x4] sm:$0x1]  ;;  %v2805_v5 = vld [vmem:[%s2792_s14 + $0x10] sm:$0xf]  ;;  %v389_v6 = vld [vmem:[%s2792_s14 + $0x14] sm:$0x1]  ;;  %s359_s12 = sadd.s32 %s2387_s30, %s2781_s18 }
  0x24   : > { %v2256_v7 = vcombine.low %v384_v2, %v385_v4  ;;  %v2809_v8 = vcombine.low %v2805_v5, %v389_v6  ;;  %v2812_v9 = vld [vmem:[%s2792_s14 + $0x18] sm:$0xf]  ;;  %v391_v10 = vld [vmem:[%s2792_s14 + $0x1c] sm:$0x1]  ;;  %v2816_v11 = vld [vmem:[%s2792_s14 + $0x28] sm:$0xf] }
  0x25   : > { %v4256_v12 = vrot.slane %v2801_v3, 1  ;;  %v2820_v13 = vcombine.low %v2812_v9, %v391_v10  ;;  %v492_v14 = vshrl.u32 %v2801_v3, 16  ;;  %v494_v15 = vshll.u32 %v2801_v3, 16  ;;  %v395_v16 = vld [vmem:[%s2792_s14 + $0x2c] sm:$0x1]  ;;  %s4450_s17 = smov (!%p2827_p1, %s363_s17), 9 }
  0x26   : > { %v556_v17 = vrot.slane %v2256_v7, 1  ;;  %v499_v18 = vshrl.u32 %v2809_v8, 16  ;;  %v501_v19 = vshll.u32 %v2809_v8, 16  ;;  %v2834_v20 = vld [vmem:[%s2792_s14 + $0x20] sm:$0xf]  ;;  %v485_v21 = vshrl.u32 %v2256_v7, 16 }
  0x27   : > { %566 = vrot.lane.b32.xlu1 %v4256_v12, %s2651_s29  ;;  %v487_v22 = vshll.u32 %v2256_v7, 16  ;;  %v506_v23 = vshrl.u32 %v2820_v13, 16  ;;  %v508_v24 = vshll.u32 %v2820_v13, 16  ;;  %v393_v25 = vld [vmem:[%s2792_s14 + $0x24] sm:$0x1]  ;;  %v496_v27 = vrot.slane %v494_v15, 1 }
  0x28   : > { %564 = vrot.lane.b32.xlu0 %v556_v17, %s2651_s29  ;;  %v503_v26 = vrot.slane %v501_v19, 1  ;;  %v2261_v28 = vcombine.low %v2816_v11, %v395_v16  ;;  %v2849_v29 = vcombine.low %v2834_v20, %v393_v25  ;;  %v2852_v30 = vld [vmem:[%s2792_s14 + $0x38] sm:$0xf]  ;;  %v399_v31 = vld [vmem:[%s2792_s14 + $0x3c] sm:$0x1]  ;;  %s2251_s20 = sshll.u32 %s359_s12, 2 }
  0x29   : > { %v489_v32 = vrot.slane %v487_v22, 1  ;;  %v510_v33 = vrot.slane %v508_v24, 1  ;;  %v2856_v34 = vcombine.low %v2852_v30, %v399_v31  ;;  %v2859_v35 = vld [vmem:[%s2792_s14 + $0x30] sm:$0xf]  ;;  %v397_v36 = vld [vmem:[%s2792_s14 + $0x34] sm:$0x1]  ;;  %v2878_v46 = vor.u32 %v496_v27, %v492_v14  ;;  %s2893_s12 = scalar_lea.vmem %s4246_s1, %s2251_s20 }
  0x2a   : > { %v2862_v37 = vor.u32 %v503_v26, %v499_v18  ;;  %v522_v38 = vshll.u32 %v2261_v28, 16  ;;  %v520_v40 = vshrl.u32 %v2261_v28, 16  ;;  %v515_v41 = vshll.u32 %v2849_v29, 16  ;;  %s2388_s13 = smul.u32 20, %s4450_s17  ;;  %v2905_v58 = vld [vmem:[%s2893_s12 + $0x18] sm:$0xf] }
  0x2b   : > { %v490_v39 = vor.u32 %v489_v32, %v485_v21  ;;  %v2872_v42 = vor.u32 %v510_v33, %v506_v23  ;;  %v536_v44 = vshll.u32 %v2856_v34, 16  ;;  %v2262_v45 = vcombine.low %v2859_v35, %v397_v36  ;;  %v411_v59 = vld [vmem:[%s2893_s12 + $0x1c] sm:$0x1]  ;;  %v2909_v60 = vld [vmem:[%s2893_s12 + $0x10] sm:$0xf]  ;;  %s2653_s30 = smov 12  }
  0x2c   : > { %544 = vrot.lane.b32.xlu1 %v2862_v37, %s2652_s9  ;;  %v524_v43 = vrot.slane %v522_v38, 1  ;;  %v513_v47 = vshrl.u32 %v2849_v29, 16  ;;  %v517_v48 = vrot.slane %v515_v41, 1  ;;  %v534_v51 = vshrl.u32 %v2856_v34, 16  ;;  %s370_s17 = sadd.s32 %s2388_s13, %s2781_s18  ;;  %v409_v61 = vld [vmem:[%s2893_s12 + $0x14] sm:$0x1] }
  0x2d   : > { %540 = vrot.lane.b32.xlu0 %v490_v39, %s2652_s9  ;;  %v529_v49 = vshll.u32 %v2262_v45, 16  ;;  %v538_v52 = vrot.slane %v536_v44, 1  ;;  %v527_v54 = vshrl.u32 %v2262_v45, 16  ;;  %s2252_s20 = sshll.u32 %s370_s17, 2  ;;  %v2915_v62 = vrot.slane %v2820_v13, 1  ;;  %s2654_s17 = smov 16  }
  0x2e   : > { %v2883_v50 = vor.u32 %v524_v43, %v520_v40  ;;  %v2888_v53 = vor.u32 %v517_v48, %v513_v47  ;;  %v2918_v63 = vcombine.low %v2905_v58, %v411_v59  ;;  %v2923_v1 = vrot.slane %v2809_v8, 1  ;;  %v414_v4 = vld [vmem:[%s2893_s12 + $0x28] sm:$0xf]  ;;  %v415_v6 = vld [vmem:[%s2893_s12 + $0x2c] sm:$0x1]  ;;  %s2937_s19 = scalar_lea.vmem %s4247_s2, %s2252_s20  ;;  %s4267_s20 = smov 20  }
  0x2f   : > { %v531_v55 = vrot.slane %v529_v49, 1  ;;  %v2897_v56 = vor.u32 %v538_v52, %v534_v51  ;;  %v2926_v2 = vcombine.low %v2909_v60, %v409_v61  ;;  %v2931_v7 = vld [vmem:[%s2893_s12 + $0x20] sm:$0xf]  ;;  %v413_v10 = vld [vmem:[%s2893_s12 + $0x24] sm:$0x1]  ;;  %v2941_v8 = vrot.slane %v2261_v28, 1 }
  0x30   : > { %546 = vrot.lane.b32.xlu1 %v2872_v42, %s2652_s9  ;;  %v799_v13 = vshll.u32 %v2918_v63, 16  ;;  %v2944_v14 = vcombine.low %v414_v4, %v415_v6  ;;  %v2949_v15 = vrot.slane %v2849_v29, 1  ;;  %v2953_v17 = vcombine.low %v2931_v7, %v413_v10  ;;  %v426_v18 = vld [vmem:[%s2937_s19 + $0x8] sm:$0xf]  ;;  %v424_v19 = vld [vmem:[%s2937_s19] sm:$0xf] }
  0x31   : > { %542 = vrot.lane.b32.xlu0 %v2878_v46, %s2652_s9  ;;  %v2902_v57 = vor.u32 %v531_v55, %v527_v54  ;;  %v792_v16 = vshll.u32 %v2926_v2, 16  ;;  %v2958_v21 = vrot.slane %v2856_v34, 1  ;;  %v2960_v22 = vrot.slane %v2262_v45, 1  ;;  %v430_v32 = vld [vmem:[%s2937_s19 + $0x18] sm:$0xf]  ;;  %s4252_s18 = smov 24  }
  0x32   : > { %v797_v23 = vshrl.u32 %v2918_v63, 16  ;;  %v801_v24 = vrot.slane %v799_v13, 1  ;;  %v813_v25 = vshll.u32 %v2944_v14, 16  ;;  %v2296_v26 = vcombine.low %v426_v18, %v426_v18  ;;  %v428_v33 = vld [vmem:[%s2937_s19 + $0x10] sm:$0xf]  ;;  %s4254_s13 = smov 28  }
  0x33   : > { %v790_v27 = vshrl.u32 %v2926_v2, 16  ;;  %v794_v28 = vrot.slane %v792_v16, 1  ;;  %v806_v29 = vshll.u32 %v2953_v17, 16  ;;  %v2295_v31 = vcombine.low %v424_v19, %v424_v19 }
  0x34   : > { %550 = vrot.lane.b32.xlu1 %v2883_v50, %s2652_s9  ;;  %v811_v34 = vshrl.u32 %v2944_v14, 16  ;;  %v804_v36 = vshrl.u32 %v2953_v17, 16  ;;  %v2976_v38 = vor.u32 %v801_v24, %v797_v23  ;;  %v815_v39 = vrot.slane %v813_v25, 1  ;;  %v427_v24 = vld [vmem:[%s2937_s19 + $0xc] sm:$0x1] }
  0x35   : > { %548 = vrot.lane.b32.xlu0 %v2888_v53, %s2652_s9  ;;  %v1273_v40 = vshrl.u32 %v2296_v26, 16  ;;  %v2298_v41 = vcombine.low %v430_v32, %v430_v32  ;;  %v2980_v43 = vor.u32 %v794_v28, %v790_v27  ;;  %v808_v44 = vrot.slane %v806_v29, 1  ;;  %v431_v29 = vld [vmem:[%s2937_s19 + $0x1c] sm:$0x1] }
  0x36   : > { %v1266_v45 = vshrl.u32 %v2295_v31, 16  ;;  %v2297_v47 = vcombine.low %v428_v33, %v428_v33  ;;  %v2984_v48 = vor.u32 %v815_v39, %v811_v34  ;;  %v1276_v51 = vshll.u32 %v2296_v26, 16  ;;  %v425_v26 = vld [vmem:[%s2937_s19 + $0x4] sm:$0x1]  ;;  %v429_v34 = vld [vmem:[%s2937_s19 + $0x14] sm:$0x1] }
  0x37   : > { %v1275_v49 = vrot.slane %v1273_v40, 7  ;;  %v1287_v52 = vshrl.u32 %v2298_v41, 16  ;;  %v2988_v54 = vor.u32 %v808_v44, %v804_v36  ;;  %v1269_v59 = vshll.u32 %v2295_v31, 16 }
  0x38   : > { %554 = vrot.lane.b32.xlu1 %v2897_v56, %s2652_s9  ;;  %4286 = vst [vmem:[#allocation5_spill] sm:$0xff] %v2984_v48  ;;  %v1268_v55 = vrot.slane %v1266_v45, 7  ;;  %v1280_v61 = vshrl.u32 %v2297_v47, 16  ;;  %v1290_v10 = vshll.u32 %v2298_v41, 16  ;;  %v1283_v23 = vshll.u32 %v2297_v47, 16 }
  0x39   : > { %552 = vrot.lane.b32.xlu0 %v2902_v57, %s2652_s9  ;;  %v1278_v4 = vor.u32 %v1276_v51, %v1275_v49  ;;  %v1289_v6 = vrot.slane %v1287_v52, 7  ;;  %v2304_v28 = vcombine.low %v426_v18, %v427_v24  ;;  %v2303_v31 = vcombine.low %v424_v19, %v425_v26  ;;  %v432_v51 = vld [vmem:[%s2937_s19 + $0x20] sm:$0xf] }
  0x3a   : > { %v1271_v13 = vor.u32 %v1269_v59, %v1268_v55  ;;  %v1282_v16 = vrot.slane %v1280_v61, 7  ;;  %v3008_v40 = vcombine.low %v430_v32, %v431_v29  ;;  %v3010_v41 = vcombine.low %v428_v33, %v429_v34  ;;  %v433_v29 = vld [vmem:[%s2937_s19 + $0x24] sm:$0x1] }
  0x3b   : > { %v2996_v25 = vor.u32 %v1290_v10, %v1289_v6  ;;  %v1387_v36 = vshll.u32 %v2304_v28, 16  ;;  %v1380_v39 = vshll.u32 %v2303_v31, 16  ;;  %v1385_v18 = vshrl.u32 %v2304_v28, 16 }
  0x3c   : > { %570 = vrot.lane.b32.xlu1 %v2915_v62, %s2651_s29  ;;  %v3000_v27 = vor.u32 %v1283_v23, %v1282_v16  ;;  %v1401_v19 = vshll.u32 %v3008_v40, 16  ;;  %v1378_v45 = vshrl.u32 %v2303_v31, 16  ;;  %v1394_v49 = vshll.u32 %v3010_v41, 16 }
  0x3d   : > { %568 = vrot.lane.b32.xlu0 %v2923_v1, %s2651_s29  ;;  %v1389_v44 = vrot.slane %v1387_v36, 1  ;;  %v1382_v47 = vrot.slane %v1380_v39, 1  ;;  %v1399_v33 = vshrl.u32 %v3008_v40, 16  ;;  %v2299_v55 = vcombine.low %v432_v51, %v432_v51  ;;  %v418_v36 = vld [vmem:[%s2893_s12 + $0x38] sm:$0xf] }
  0x3e   : > { %v1403_v52 = vrot.slane %v1401_v19, 1  ;;  %v1392_v61 = vshrl.u32 %v3010_v41, 16  ;;  %v1396_v6 = vrot.slane %v1394_v49, 1  ;;  %v416_v39 = vld [vmem:[%s2893_s12 + $0x30] sm:$0xf] }
  0x3f   : > { %v1390_v32 = vor.u32 %v1389_v44, %v1385_v18  ;;  %v1383_v59 = vor.u32 %v1382_v47, %v1378_v45  ;;  %v1297_v24 = vshll.u32 %v2299_v55, 16  ;;  %v417_v18 = vld [vmem:[%s2893_s12 + $0x34] sm:$0x1]  ;;  %v434_v49 = vld [vmem:[%s2937_s19 + $0x28] sm:$0xf] }
  0x40   : > { %574 = vrot.lane.b32.xlu1 %v2941_v8, %s2651_s29  ;;  %v3024_v10 = vor.u32 %v1403_v52, %v1399_v33  ;;  %v3027_v16 = vor.u32 %v1396_v6, %v1392_v61  ;;  %v3060_v47 = vcombine.low %v416_v39, %v417_v18  ;;  %v2300_v33 = vcombine.low %v434_v49, %v434_v49 }
  0x41   : > { %572 = vrot.lane.b32.xlu0 %v2949_v15, %s2651_s29 }
  0x42   : > { %4288 = vst [vmem:[#allocation7_spill] sm:$0xff] %v3060_v47  ;;  %v820_v52 = vshll.u32 %v3060_v47, 16  ;;  %v1301_v61 = vshrl.u32 %v2300_v33, 16  ;;  %v818_v6 = vshrl.u32 %v3060_v47, 16 }
  0x44   : > { %578 = vrot.lane.b32.xlu1 %v2958_v21, %s2651_s29 }
  0x45   : > { %576 = vrot.lane.b32.xlu0 %v2960_v22, %s2651_s29 }
  0x48   : > { %1227 = vrot.lane.b32.xlu1 %v2976_v38, %s2652_s9 }
  0x49   : > { %1225 = vrot.lane.b32.xlu0 %v2980_v43, %s2652_s9 }
  0x4c   : > { %1231 = vrot.lane.b32.xlu1 %v2984_v48, %s2652_s9 }
  0x4d   : > { %1229 = vrot.lane.b32.xlu0 %v2988_v54, %s2652_s9 }
  0x50   : > { %1323 = vrot.lane.b32.xlu1 %v1278_v4, %s2651_s29 }
  0x51   : > { %1321 = vrot.lane.b32.xlu0 %v1271_v13, %s2651_s29  ;;  %v1294_v13 = vshrl.u32 %v2299_v55, 16 }
  0x53   : > { %v1296_v23 = vrot.slane %v1294_v13, 7  ;;  %v822_v13 = vrot.slane %v820_v52, 1 }
  0x54   : > { %1327 = vrot.lane.b32.xlu1 %v2996_v25, %s2651_s29 }
  0x55   : > { %1325 = vrot.lane.b32.xlu0 %v3000_v27, %s2651_s29  ;;  %v3035_v26 = vor.u32 %v1297_v24, %v1296_v23  ;;  %v422_v23 = vld [vmem:[%s2893_s12 + $0x48] sm:$0xf]  ;;  %v423_v24 = vld [vmem:[%s2893_s12 + $0x4c] sm:$0x1]  ;;  %v3088_v18 = vor.u32 %v822_v13, %v818_v6  ;;  %v438_v6 = vld [vmem:[%s2937_s19 + $0x38] sm:$0xf] }
  0x56   : > { %v3084_v39 = vcombine.low %v422_v23, %v423_v24  ;;  %v436_v13 = vld [vmem:[%s2937_s19 + $0x30] sm:$0xf]  ;;  %v2302_v23 = vcombine.low %v438_v6, %v438_v6  ;;  %v435_v24 = vld [vmem:[%s2937_s19 + $0x2c] sm:$0x1] }
  0x57   : > { %4291 = vst [vmem:[#allocation10_spill] sm:$0xff] %v3088_v18 }
  0x58   : > { %1363 = vrot.lane.b32.xlu1 %v2304_v28, %s2653_s30  ;;  %4290 = vst [vmem:[#allocation9_spill] sm:$0xff] %v3084_v39 }
  0x59   : > { %1361 = vrot.lane.b32.xlu0 %v2303_v31, %s2653_s30  ;;  %v3043_v31 = vcombine.low %v432_v51, %v433_v29  ;;  %v420_v29 = vld [vmem:[%s2893_s12 + $0x40] sm:$0xf] }
  0x5b   : > { %v1408_v34 = vshll.u32 %v3043_v31, 16  ;;  %v1406_v44 = vshrl.u32 %v3043_v31, 16 }
  0x5c   : > { %1367 = vrot.lane.b32.xlu1 %v3008_v40, %s2653_s30 }
  0x5d   : > { %1365 = vrot.lane.b32.xlu0 %v3010_v41, %s2653_s30  ;;  %v1410_v19 = vrot.slane %v1408_v34, 1  ;;  %v421_v34 = vld [vmem:[%s2893_s12 + $0x44] sm:$0x1] }
  0x60   : > { %1435 = vrot.lane.b32.xlu1 %v1390_v32, %s2654_s17 }
  0x61   : > { %1433 = vrot.lane.b32.xlu0 %v1383_v59, %s2654_s17 }
  0x64   : > { %1439 = vrot.lane.b32.xlu1 %v3024_v10, %s2654_s17 }
  0x65   : > { %1437 = vrot.lane.b32.xlu0 %v3027_v16, %s2654_s17 }
  0x68   : > { %1461 = vrot.lane.b32.xlu1 %v3000_v27, %s4267_s20 }
  0x69   : > { %1459 = vrot.lane.b32.xlu0 %v1278_v4, %s4267_s20  ;;  %v419_v4 = vld [vmem:[%s2893_s12 + $0x3c] sm:$0x1] }
  0x6a   : > { %v3056_v45 = vcombine.low %v418_v36, %v419_v4  ;;  %v1303_v36 = vrot.slane %v1301_v61, 7  ;;  %v1304_v4 = vshll.u32 %v2300_v33, 16 }
  0x6c   : > { %1465 = vrot.lane.b32.xlu1 %v3035_v26, %s4267_s20  ;;  %4287 = vst [vmem:[#allocation6_spill] sm:$0xff] %v3056_v45  ;;  %v827_v51 = vshll.u32 %v3056_v45, 16  ;;  %v825_v55 = vshrl.u32 %v3056_v45, 16 }
  0x6d   : > { %1463 = vrot.lane.b32.xlu0 %v2996_v25, %s4267_s20 }
  0x6e   : > { %v829_v59 = vrot.slane %v827_v51, 1 }
  0x70   : > { %1480 = vrot.lane.b32.xlu1 %v3010_v41, %s4252_s18 }
  0x71   : > { %1478 = vrot.lane.b32.xlu0 %v2304_v28, %s4252_s18  ;;  %v3065_v28 = vor.u32 %v1410_v19, %v1406_v44  ;;  %v3090_v44 = vcombine.low %v420_v29, %v421_v34  ;;  %v3094_v19 = vor.u32 %v1304_v4, %v1303_v36  ;;  %v2301_v29 = vcombine.low %v436_v13, %v436_v13 }
  0x72   : > { %v3118_v34 = vcombine.low %v434_v49, %v435_v24  ;;  %v1318_v4 = vshll.u32 %v2302_v23, 16 }
  0x73   : > { %4292 = vst [vmem:[#allocation11_spill] sm:$0xff] %v3090_v44  ;;  %v896_v51 = vshll.u32 %v3090_v44, 16  ;;  %v894_v52 = vshrl.u32 %v3090_v44, 16 }
  0x74   : > { %1484 = vrot.lane.b32.xlu1 %v3043_v31, %s4252_s18 }
  0x75   : > { %1482 = vrot.lane.b32.xlu0 %v3008_v40, %s4252_s18  ;;  %s2658_s18 = smov 32  }
  0x78   : > { %1503 = vrot.lane.b32.xlu1 %v3027_v16, %s4254_s13 }
  0x79   : > { %1501 = vrot.lane.b32.xlu0 %v1390_v32, %s4254_s13  ;;  %v3082_v32 = vor.u32 %v829_v59, %v825_v55  ;;  %v898_v55 = vrot.slane %v896_v51, 1  ;;  %v1311_v51 = vshll.u32 %v2301_v29, 16 }
  0x7b   : > { %4289 = vst [vmem:[#allocation8_spill] sm:$0xff] %v3082_v32  ;;  %v3110_v61 = vor.u32 %v898_v55, %v894_v52 }
  0x7c   : > { %1507 = vrot.lane.b32.xlu1 %v3065_v28, %s4254_s13 }
  0x7d   : > { %1505 = vrot.lane.b32.xlu0 %v3024_v10, %s4254_s13  ;;  %s4273_s13 = smov 36   ;;  %4293 = vst [vmem:[#allocation12_spill] sm:$0xff] %v3110_v61 }
  0x80   : > { %1529 = vrot.lane.b32.xlu1 %v2996_v25, %s2658_s18  ;;  %v1221_v25 = vshll.u32 %v3084_v39, 16 }
  0x81   : > { %1527 = vrot.lane.b32.xlu0 %v3000_v27, %s2658_s18  ;;  %v1219_v27 = vshrl.u32 %v3084_v39, 16 }
  0x82   : > { %v1223_v33 = vrot.slane %v1221_v25, 1 }
  0x84   : > { %1235 = vrot.lane.b32.xlu1 %v3082_v32, %s2652_s9  ;;  %v1224_v59 = vor.u32 %v1223_v33, %v1219_v27  ;;  %v1415_v33 = vshll.u32 %v3118_v34, 16 }
  0x85   : > { %1233 = vrot.lane.b32.xlu0 %v3088_v18, %s2652_s9 }
  0x86   : > { %v1417_v24 = vrot.slane %v1415_v33, 1 }
  0x88   : > { %1533 = vrot.lane.b32.xlu1 %v3094_v19, %s2658_s18 }
  0x89   : > { %1531 = vrot.lane.b32.xlu0 %v3035_v26, %s2658_s18 }
  0x8c   : > { %1548 = vrot.lane.b32.xlu1 %v3008_v40, %s4273_s13  ;;  %v1315_v40 = vshrl.u32 %v2302_v23, 16  ;;  %v1413_v23 = vshrl.u32 %v3118_v34, 16 }
  0x8d   : > { %1546 = vrot.lane.b32.xlu0 %v3010_v41, %s4273_s13  ;;  %v1308_v41 = vshrl.u32 %v2301_v29, 16  ;;  %v439_v29 = vld [vmem:[%s2937_s19 + $0x3c] sm:$0x1] }
  0x8e   : > { %v1317_v36 = vrot.slane %v1315_v40, 7  ;;  %v437_v40 = vld [vmem:[%s2937_s19 + $0x34] sm:$0x1] }
  0x8f   : > { %v1310_v49 = vrot.slane %v1308_v41, 7  ;;  %v1418_v41 = vor.u32 %v1417_v24, %v1413_v23  ;;  %v440_v24 = vld [vmem:[%s2937_s19 + $0x40] sm:$0xf] }
  0x90   : > { %1239 = vrot.lane.b32.xlu1 %v1224_v59, %s2652_s9 }
  0x91   : > { %1237 = vrot.lane.b32.xlu0 %v3110_v61, %s2652_s9  ;;  %s2660_s9 = smov 40   ;;  %v3139_v52 = vor.u32 %v1311_v51, %v1310_v49  ;;  %v3164_v49 = vcombine.low %v436_v13, %v437_v40 }
  0x93   : > { %v1422_v23 = vshll.u32 %v3164_v49, 16  ;;  %v1420_v40 = vshrl.u32 %v3164_v49, 16 }
  0x94   : > { %1331 = vrot.lane.b32.xlu1 %v3094_v19, %s2651_s29 }
  0x95   : > { %1329 = vrot.lane.b32.xlu0 %v3035_v26, %s2651_s29  ;;  %v3134_v26 = vor.u32 %v1318_v4, %v1317_v36  ;;  %v3160_v36 = vcombine.low %v438_v6, %v439_v29  ;;  %v2311_v29 = vcombine.low %v440_v24, %v440_v24  ;;  %v1424_v44 = vrot.slane %v1422_v23, 1 }
  0x97   : > { %v1429_v33 = vshll.u32 %v3160_v36, 16  ;;  %v1427_v6 = vshrl.u32 %v3160_v36, 16  ;;  %v1456_v47 = vshll.u32 %v2311_v29, 16 }
  0x98   : > { %1552 = vrot.lane.b32.xlu1 %v3118_v34, %s4273_s13 }
  0x99   : > { %1550 = vrot.lane.b32.xlu0 %v3043_v31, %s4273_s13  ;;  %v3128_v25 = vpop.permute.xlu1 %566  ;;  %v1431_v13 = vrot.slane %v1429_v33, 1  ;;  %v3193_v33 = vor.u32 %v1424_v44, %v1420_v40 }
  0x9a   : > { %4294 = vst [vmem:[#allocation13_spill] sm:$0xff] %v3128_v25  ;;  %v3130_v27 = vpop.permute.xlu0 %564 }
  0x9b   : > { %4295 = vst [vmem:[#allocation14_spill] sm:$0xff] %v3130_v27 }
  0x9c   : > { %1571 = vrot.lane.b32.xlu1 %v3024_v10, %s2660_s9 }
  0x9d   : > { %1569 = vrot.lane.b32.xlu0 %v3027_v16, %s2660_s9 }
  0x9e   : > { %v3141_v55 = vpop.permute.xlu1 %544 }
  0x9f   : > { %v3143_v59 = vpop.permute.xlu0 %540 }
  0xa0   : > { %1335 = vrot.lane.b32.xlu1 %v3134_v26, %s2651_s29 }
  0xa1   : > { %1333 = vrot.lane.b32.xlu0 %v3139_v52, %s2651_s29  ;;  %s4308_s29 = smov 24  }
  0xa2   : > { %v3150_v10 = vpop.permute.xlu1 %546 }
  0xa3   : > { %4296 = vst [vmem:[#allocation15_spill] sm:$0xff] %v3150_v10  ;;  %v3153_v16 = vpop.permute.xlu0 %542 }
  0xa4   : > { %4297 = vst [vmem:[#allocation16_spill] sm:$0xff] %v3153_v16  ;;  %1371 = vrot.lane.b32.xlu1 %v3118_v34, %s2653_s30 }
  0xa5   : > { %1369 = vrot.lane.b32.xlu0 %v3043_v31, %s2653_s30 }
  0xa6   : > { %v3162_v4 = vpop.permute.xlu1 %550 }
  0xa7   : > { %4298 = vst [vmem:[#allocation17_spill] sm:$0xff] %v3162_v4  ;;  %v3166_v51 = vpop.permute.xlu0 %548 }
  0xa8   : > { %4299 = vst [vmem:[#allocation18_spill] sm:$0xff] %v3166_v51  ;;  %1575 = vrot.lane.b32.xlu1 %v1418_v41, %s2660_s9 }
  0xa9   : > { %1573 = vrot.lane.b32.xlu0 %v3065_v28, %s2660_s9 }
  0xaa   : > { %v3174_v12 = vpop.permute.xlu1 %554 }
  0xab   : > { %4300 = vst [vmem:[#allocation19_spill] sm:$0xff] %v3174_v12  ;;  %v3176_v31 = vpop.permute.xlu0 %552  ;;  %v1453_v12 = vshrl.u32 %v2311_v29, 16 }
  0xac   : > { %4301 = vst [vmem:[#allocation20_spill] sm:$0xff] %v3176_v31  ;;  %1375 = vrot.lane.b32.xlu1 %v3160_v36, %s2653_s30  ;;  %v3189_v31 = vor.u32 %v1431_v13, %v1427_v6 }
  0xad   : > { %1373 = vrot.lane.b32.xlu0 %v3164_v49, %s2653_s30  ;;  %v1455_v23 = vrot.slane %v1453_v12, 7  ;;  %v441_v12 = vld [vmem:[%s2937_s19 + $0x44] sm:$0x1] }
  0xae   : > { %v3184_v61 = vpop.permute.xlu1 %570 }
  0xaf   : > { %4302 = vst [vmem:[#allocation21_spill] sm:$0xff] %v3184_v61  ;;  %v3186_v39 = vpop.permute.xlu0 %568 }
  0xb0   : > { %4303 = vst [vmem:[#allocation22_spill] sm:$0xff] %v3186_v39  ;;  %1443 = vrot.lane.b32.xlu1 %v1418_v41, %s2654_s17 }
  0xb1   : > { %1441 = vrot.lane.b32.xlu0 %v3065_v28, %s2654_s17  ;;  %v1458_v28 = vor.u32 %v1456_v47, %v1455_v23 }
  0xb2   : > { %v3195_v51 = vpop.permute.xlu1 %574 }
  0xb3   : > { %4304 = vst [vmem:[#allocation23_spill] sm:$0xff] %v3195_v51  ;;  %v3197_v4 = vpop.permute.xlu0 %572 }
  0xb4   : > { %4305 = vst [vmem:[#allocation24_spill] sm:$0xff] %v3197_v4  ;;  %1447 = vrot.lane.b32.xlu1 %v3189_v31, %s2654_s17 }
  0xb5   : > { %1445 = vrot.lane.b32.xlu0 %v3193_v33, %s2654_s17 }
  0xb6   : > { %v3203_v6 = vpop.permute.xlu1 %578 }
  0xb7   : > { %4306 = vst [vmem:[#allocation25_spill] sm:$0xff] %v3203_v6  ;;  %v3205_v13 = vpop.permute.xlu0 %576 }
  0xb8   : > { %4307 = vst [vmem:[#allocation26_spill] sm:$0xff] %v3205_v13  ;;  %1469 = vrot.lane.b32.xlu1 %v3139_v52, %s4267_s20  ;;  %v2312_v13 = vcombine.low %v440_v24, %v441_v12 }
  0xb9   : > { %1467 = vrot.lane.b32.xlu0 %v3094_v19, %s4267_s20  ;;  %v442_v19 = vld [vmem:[%s2937_s19 + $0x48] sm:$0xf] }
  0xba   : > { %v3211_v44 = vpop.permute.xlu1 %1227  ;;  %v1497_v47 = vshll.u32 %v2312_v13, 16  ;;  %v1495_v51 = vshrl.u32 %v2312_v13, 16  ;;  %v2313_v18 = vcombine.low %v442_v19, %v442_v19 }
  0xbb   : > { %v3213_v40 = vpop.permute.xlu0 %1225 }
  0xbc   : > { %1473 = vrot.lane.b32.xlu1 %v1458_v28, %s4267_s20  ;;  %v1499_v45 = vrot.slane %v1497_v47, 1  ;;  %v1521_v32 = vshrl.u32 %v2313_v18, 16  ;;  %v1524_v27 = vshll.u32 %v2313_v18, 16 }
  0xbd   : > { %1471 = vrot.lane.b32.xlu0 %v3134_v26, %s4267_s20  ;;  %s4309_s20 = smov 28  }
  0xbe   : > { %v3219_v29 = vpop.permute.xlu1 %1231  ;;  %v1523_v47 = vrot.slane %v1521_v32, 7  ;;  %v443_v32 = vld [vmem:[%s2937_s19 + $0x4c] sm:$0x1]  ;;  %s4317_s19 = smov 20  }
  0xbf   : > { %v3221_v6 = vpop.permute.xlu0 %1229  ;;  %v2314_v16 = vcombine.low %v442_v19, %v443_v32 }
  0xc0   : > { %1488 = vrot.lane.b32.xlu1 %v3164_v49, %s4308_s29 }
  0xc1   : > { %1486 = vrot.lane.b32.xlu0 %v3118_v34, %s4308_s29  ;;  %v1500_v34 = vor.u32 %v1499_v45, %v1495_v51  ;;  %v1526_v45 = vor.u32 %v1524_v27, %v1523_v47  ;;  %v1565_v27 = vshll.u32 %v2314_v16, 16  ;;  %v1563_v47 = vshrl.u32 %v2314_v16, 16 }
  0xc2   : > { %v3228_v23 = vpop.permute.xlu1 %1323 }
  0xc3   : > { %v3230_v4 = vpop.permute.xlu0 %1321 }
  0xc4   : > { %1492 = vrot.lane.b32.xlu1 %v2312_v13, %s4308_s29 }
  0xc5   : > { %1490 = vrot.lane.b32.xlu0 %v3160_v36, %s4308_s29 }
  0xc6   : > { %v3235_v24 = vpop.permute.xlu1 %1327 }
  0xc7   : > { %v3237_v12 = vpop.permute.xlu0 %1325 }
  0xc8   : > { %1511 = vrot.lane.b32.xlu1 %v3193_v33, %s4309_s20 }
  0xc9   : > { %1509 = vrot.lane.b32.xlu0 %v1418_v41, %s4309_s20 }
  0xca   : > { %v3242_v48 = vpop.permute.xlu1 %1363 }
  0xcb   : > { %v3244_v25 = vpop.permute.xlu0 %1361 }
  0xcc   : > { %1515 = vrot.lane.b32.xlu1 %v1500_v34, %s4309_s20 }
  0xcd   : > { %1513 = vrot.lane.b32.xlu0 %v3189_v31, %s4309_s20 }
  0xce   : > { %v3249_v39 = vpop.permute.xlu1 %1367 }
  0xcf   : > { %v3251_v61 = vpop.permute.xlu0 %1365 }
  0xd0   : > { %1537 = vrot.lane.b32.xlu1 %v3134_v26, %s2658_s18 }
  0xd1   : > { %1535 = vrot.lane.b32.xlu0 %v3139_v52, %s2658_s18 }
  0xd2   : > { %v3257_v41 = vpop.permute.xlu1 %1435 }
  0xd3   : > { %v3259_v51 = vpop.permute.xlu0 %1433 }
  0xd4   : > { %1541 = vrot.lane.b32.xlu1 %v1526_v45, %s2658_s18 }
  0xd5   : > { %1539 = vrot.lane.b32.xlu0 %v1458_v28, %s2658_s18  ;;  %v1567_v28 = vrot.slane %v1565_v27, 1 }
  0xd6   : > { %v3264_v18 = vpop.permute.xlu1 %1439 }
  0xd7   : > { %v3266_v10 = vpop.permute.xlu0 %1437 }
  0xd8   : > { %1556 = vrot.lane.b32.xlu1 %v3160_v36, %s4273_s13  ;;  %v1568_v36 = vor.u32 %v1567_v28, %v1563_v47  ;;  %v2266_v47 = vcombine.low %v2812_v9, %v2812_v9 }
  0xd9   : > { %1554 = vrot.lane.b32.xlu0 %v3164_v49, %s4273_s13 }
  0xda   : > { %v3272_v26 = vpop.permute.xlu1 %1461 }
  0xdb   : > { %v3274_v52 = vpop.permute.xlu0 %1459 }
  0xdc   : > { %1560 = vrot.lane.b32.xlu1 %v2314_v16, %s4273_s13  ;;  %v2265_v16 = vcombine.low %v2805_v5, %v2805_v5 }
  0xdd   : > { %1558 = vrot.lane.b32.xlu0 %v2312_v13, %s4273_s13  ;;  %v2264_v13 = vcombine.low %v2796_v0, %v2796_v0 }
  0xde   : > { %v3278_v19 = vpop.permute.xlu1 %1465 }
  0xdf   : > { %v3280_v45 = vpop.permute.xlu0 %1463 }
  0xe0   : > { %4310 = vst [vmem:[#allocation27_spill] sm:$0xff] %v3280_v45  ;;  %1579 = vrot.lane.b32.xlu1 %v3189_v31, %s2660_s9 }
  0xe1   : > { %1577 = vrot.lane.b32.xlu0 %v3193_v33, %s2660_s9  ;;  %v2267_v33 = vcombine.low %v2834_v20, %v2834_v20 }
  0xe2   : > { %v3286_v49 = vpop.permute.xlu1 %1480 }
  0xe3   : > { %v3288_v32 = vpop.permute.xlu0 %1478 }
  0xe4   : > { %1583 = vrot.lane.b32.xlu1 %v1568_v36, %s2660_s9 }
  0xe5   : > { %1581 = vrot.lane.b32.xlu0 %v1500_v34, %s2660_s9 }
  0xe6   : > { %v3296_v27 = vpop.permute.xlu1 %1484 }
  0xe7   : > { %4311 = vst [vmem:[#allocation28_spill] sm:$0xff] %v3296_v27  ;;  %v3298_v31 = vpop.permute.xlu0 %1482 }
  0xe8   : > { %4312 = vst [vmem:[#allocation29_spill] sm:$0xff] %v3298_v31  ;;  %592 = vrot.lane.b32.xlu1 %v2265_v16, %s2653_s30 }
  0xe9   : > { %590 = vrot.lane.b32.xlu0 %v2264_v13, %s2653_s30 }
  0xea   : > { %v3306_v5 = vpop.permute.xlu1 %1503 }
  0xeb   : > { %v3308_v34 = vpop.permute.xlu0 %1501 }
  0xec   : > { %596 = vrot.lane.b32.xlu1 %v2267_v33, %s2653_s30 }
  0xed   : > { %594 = vrot.lane.b32.xlu0 %v2266_v47, %s2653_s30 }
  0xee   : > { %v3312_v0 = vpop.permute.xlu1 %1507 }
  0xef   : > { %4313 = vst [vmem:[#allocation30_spill] sm:$0xff] %v3312_v0  ;;  %v3314_v28 = vpop.permute.xlu0 %1505 }
  0xf0   : > { %4314 = vst [vmem:[#allocation31_spill] sm:$0xff] %v3314_v28  ;;  %618 = vrot.lane.b32.xlu1 %v2862_v37, %s2654_s17 }
  0xf1   : > { %616 = vrot.lane.b32.xlu0 %v2878_v46, %s2654_s17  ;;  %v4318_v46 = vrot.slane %v2801_v3, 1  ;;  %v2268_v3 = vcombine.low %v2816_v11, %v2816_v11 }
  0xf2   : > { %v3320_v20 = vpop.permute.xlu1 %1529 }
  0xf3   : > { %v3322_v9 = vpop.permute.xlu0 %1527 }
  0xf4   : > { %622 = vrot.lane.b32.xlu1 %v2888_v53, %s2654_s17 }
  0xf5   : > { %620 = vrot.lane.b32.xlu0 %v2872_v42, %s2654_s17 }
  0xf6   : > { %v3328_v36 = vpop.permute.xlu1 %1235 }
  0xf7   : > { %4315 = vst [vmem:[#allocation32_spill] sm:$0xff] %v3328_v36  ;;  %v3330_v13 = vpop.permute.xlu0 %1233 }
  0xf8   : > { %4316 = vst [vmem:[#allocation33_spill] sm:$0xff] %v3330_v13  ;;  %635 = vrot.lane.b32.xlu1 %v2923_v1, %s4317_s19 }
  0xf9   : > { %633 = vrot.lane.b32.xlu0 %v4318_v46, %s4317_s19 }
  0xfa   : > { %v3337_v28 = vpop.permute.xlu1 %1533 }
  0xfb   : > { %4319 = vst [vmem:[#allocation34_spill] sm:$0xff] %v3337_v28  ;;  %v3339_v0 = vpop.permute.xlu0 %1531 }
  0xfc   : > { %4320 = vst [vmem:[#allocation35_spill] sm:$0xff] %v3339_v0  ;;  %639 = vrot.lane.b32.xlu1 %v2949_v15, %s4317_s19 }
  0xfd   : > { %637 = vrot.lane.b32.xlu0 %v2915_v62, %s4317_s19 }
  0xfe   : > { %v3345_v36 = vpop.permute.xlu1 %1548 }
  0xff   : > { %v3347_v13 = vpop.permute.xlu0 %1546 }
 0x100   : > { %654 = vrot.lane.b32.xlu1 %v2266_v47, %s4308_s29 }
 0x101   : > { %652 = vrot.lane.b32.xlu0 %v2265_v16, %s4308_s29 }
 0x102   : > { %v3353_v46 = vpop.permute.xlu1 %1239 }
 0x103   : > { %4321 = vst [vmem:[#allocation36_spill] sm:$0xff] %v3353_v46  ;;  %v3355_v0 = vpop.permute.xlu0 %1237  ;;  %v404_v46 = vld [vmem:[%s2893_s12] sm:$0xf] }
 0x104   : > { %4322 = vst [vmem:[#allocation37_spill] sm:$0xff] %v3355_v0  ;;  %658 = vrot.lane.b32.xlu1 %v2268_v3, %s4308_s29  ;;  %v405_v0 = vld [vmem:[%s2893_s12 + $0x4] sm:$0x1] }
 0x105   : > { %656 = vrot.lane.b32.xlu0 %v2267_v33, %s4308_s29  ;;  %v407_v33 = vld [vmem:[%s2893_s12 + $0xc] sm:$0x1] }
 0x106   : > { %v3359_v28 = vpop.permute.xlu1 %1331 }
 0x107   : > { %4323 = vst [vmem:[#allocation38_spill] sm:$0xff] %v3359_v28  ;;  %v3361_v31 = vpop.permute.xlu0 %1329  ;;  %v2283_v28 = vcombine.low %v404_v46, %v405_v0  ;;  %v3408_v0 = vcombine.low %v2905_v58, %v2905_v58 }
 0x108   : > { %4324 = vst [vmem:[#allocation39_spill] sm:$0xff] %v3361_v31  ;;  %680 = vrot.lane.b32.xlu1 %v2872_v42, %s4309_s20  ;;  %v406_v42 = vld [vmem:[%s2893_s12 + $0x8] sm:$0xf] }
 0x109   : > { %678 = vrot.lane.b32.xlu0 %v2862_v37, %s4309_s20  ;;  %v3384_v37 = vcombine.low %v406_v42, %v407_v33  ;;  %v778_v33 = vshll.u32 %v2283_v28, 16 }
 0x10a   : > { %v3367_v11 = vpop.permute.xlu1 %1552 }
 0x10b   : > { %4325 = vst [vmem:[#allocation40_spill] sm:$0xff] %v3367_v11  ;;  %v3369_v16 = vpop.permute.xlu0 %1550  ;;  %v3395_v11 = vcombine.low %v406_v42, %v406_v42  ;;  %v785_v27 = vshll.u32 %v3384_v37, 16  ;;  %v783_v42 = vshrl.u32 %v3384_v37, 16 }
 0x10c   : > { %4326 = vst [vmem:[#allocation41_spill] sm:$0xff] %v3369_v16  ;;  %684 = vrot.lane.b32.xlu1 %v2883_v50, %s4309_s20 }
 0x10d   : > { %682 = vrot.lane.b32.xlu0 %v2888_v53, %s4309_s20 }
 0x10e   : > { %v3376_v47 = vpop.permute.xlu1 %1571 }
 0x10f   : > { %v3379_v31 = vpop.permute.xlu0 %1569 }
 0x110   : > { %697 = vrot.lane.b32.xlu1 %v2915_v62, %s2658_s18  ;;  %v2275_v62 = vcombine.low %v404_v46, %v404_v46  ;;  %v776_v46 = vshrl.u32 %v2283_v28, 16 }
 0x111   : > { %695 = vrot.lane.b32.xlu0 %v2923_v1, %s2658_s18 }
 0x112   : > { %v3389_v16 = vpop.permute.xlu1 %1335 }
 0x113   : > { %4327 = vst [vmem:[#allocation42_spill] sm:$0xff] %v3389_v16  ;;  %v3391_v53 = vpop.permute.xlu0 %1333  ;;  %v780_v16 = vrot.slane %v778_v33, 1  ;;  %v3434_v33 = vcombine.low %v2859_v35, %v2859_v35  ;;  %v4275_v35 = vrot.slane %v3384_v37, 1 }
 0x114   : > { %4328 = vst [vmem:[#allocation43_spill] sm:$0xff] %v3391_v53  ;;  %701 = vrot.lane.b32.xlu1 %v2941_v8, %s2658_s18  ;;  %v787_v53 = vrot.slane %v785_v27, 1 }
 0x115   : > { %699 = vrot.lane.b32.xlu0 %v2949_v15, %s2658_s18  ;;  %v3414_v15 = vcombine.low %v2909_v60, %v2909_v60  ;;  %v781_v27 = vor.u32 %v780_v16, %v776_v46 }
 0x116   : > { %v3400_v45 = vpop.permute.xlu1 %1371  ;;  %v3422_v58 = vor.u32 %v787_v53, %v783_v42 }
 0x117   : > { %4329 = vst [vmem:[#allocation44_spill] sm:$0xff] %v3400_v45  ;;  %v3402_v1 = vpop.permute.xlu0 %1369 }
 0x118   : > { %4330 = vst [vmem:[#allocation45_spill] sm:$0xff] %v3402_v1  ;;  %737 = vrot.lane.b32.xlu1 %v3395_v11, %s4273_s13 }
 0x119   : > { %735 = vrot.lane.b32.xlu0 %v2275_v62, %s4273_s13 }
 0x11a   : > { %v3416_v45 = vpop.permute.xlu1 %1575 }
 0x11b   : > { %v3418_v1 = vpop.permute.xlu0 %1573 }
 0x11c   : > { %4331 = vst [vmem:[#allocation46_spill] sm:$0xff] %v3418_v1  ;;  %741 = vrot.lane.b32.xlu1 %v3408_v0, %s4273_s13 }
 0x11d   : > { %739 = vrot.lane.b32.xlu0 %v3414_v15, %s4273_s13  ;;  %s2661_s13 = smov 44  }
 0x11e   : > { %v3426_v62 = vpop.permute.xlu1 %1375 }
 0x11f   : > { %4332 = vst [vmem:[#allocation47_spill] sm:$0xff] %v3426_v62  ;;  %v3428_v60 = vpop.permute.xlu0 %1373 }
 0x120   : > { %4333 = vst [vmem:[#allocation48_spill] sm:$0xff] %v3428_v60  ;;  %833 = vrot.lane.b32.xlu1 %v3422_v58, %s2660_s9  ;;  %v400_v60 = vld [vmem:[%s2792_s14 + $0x40] sm:$0xf] }
 0x121   : > { %831 = vrot.lane.b32.xlu0 %v781_v27, %s2660_s9  ;;  %v847_v27 = vrot.slane %v2283_v28, 1 }
 0x122   : > { %v3437_v53 = vpop.permute.xlu1 %1443 }
 0x123   : > { %4334 = vst [vmem:[#allocation49_spill] sm:$0xff] %v3437_v53  ;;  %v3439_v42 = vpop.permute.xlu0 %1441 }
 0x124   : > { %4335 = vst [vmem:[#allocation50_spill] sm:$0xff] %v3439_v42  ;;  %600 = vrot.lane.b32.xlu1 %v3434_v33, %s2653_s30 }
 0x125   : > { %598 = vrot.lane.b32.xlu0 %v2268_v3, %s2653_s30  ;;  %v3461_v3 = vcombine.low %v400_v60, %v400_v60 }
 0x126   : > { %v3444_v16 = vpop.permute.xlu1 %1447 }
 0x127   : > { %4336 = vst [vmem:[#allocation51_spill] sm:$0xff] %v3444_v16  ;;  %v3446_v46 = vpop.permute.xlu0 %1445  ;;  %v2270_v16 = vcombine.low %v2852_v30, %v2852_v30  ;;  %v4276_v30 = vrot.slane %v2918_v63, 1 }
 0x128   : > { %4337 = vst [vmem:[#allocation52_spill] sm:$0xff] %v3446_v46  ;;  %837 = vrot.lane.b32.xlu1 %v2976_v38, %s2660_s9  ;;  %v401_v46 = vld [vmem:[%s2792_s14 + $0x44] sm:$0x1] }
 0x129   : > { %835 = vrot.lane.b32.xlu0 %v2980_v43, %s2660_s9 }
 0x12a   : > { %v3454_v42 = vpop.permute.xlu1 %1469 }
 0x12b   : > { %4338 = vst [vmem:[#allocation53_spill] sm:$0xff] %v3454_v42  ;;  %v3456_v62 = vpop.permute.xlu0 %1467  ;;  %v3471_v42 = vcombine.low %v400_v60, %v401_v46  ;;  %v849_v60 = vrot.slane %v2926_v2, 1 }
 0x12c   : > { %4339 = vst [vmem:[#allocation54_spill] sm:$0xff] %v3456_v62  ;;  %857 = vrot.lane.b32.xlu1 %v4275_v35, %s2661_s13 }
 0x12d   : > { %855 = vrot.lane.b32.xlu0 %v847_v27, %s2661_s13  ;;  %v612_v27 = vshll.u32 %v3471_v42, 16 }
 0x12e   : > { %v3467_v53 = vpop.permute.xlu1 %1473 }
 0x12f   : > { %4340 = vst [vmem:[#allocation55_spill] sm:$0xff] %v3467_v53  ;;  %v3469_v28 = vpop.permute.xlu0 %1471  ;;  %v610_v53 = vshrl.u32 %v3471_v42, 16 }
 0x130   : > { %4341 = vst [vmem:[#allocation56_spill] sm:$0xff] %v3469_v28  ;;  %604 = vrot.lane.b32.xlu1 %v3461_v3, %s2653_s30 }
 0x131   : > { %602 = vrot.lane.b32.xlu0 %v2270_v16, %s2653_s30  ;;  %s4280_s30 = smov 48  }
 0x132   : > { %v3476_v35 = vpop.permute.xlu1 %1488 }
 0x133   : > { %4342 = vst [vmem:[#allocation57_spill] sm:$0xff] %v3476_v35  ;;  %v3478_v62 = vpop.permute.xlu0 %1486 }
 0x134   : > { %4343 = vst [vmem:[#allocation58_spill] sm:$0xff] %v3478_v62  ;;  %626 = vrot.lane.b32.xlu1 %v2902_v57, %s2654_s17  ;;  %v614_v62 = vrot.slane %v612_v27, 1 }
 0x135   : > { %624 = vrot.lane.b32.xlu0 %v2883_v50, %s2654_s17 }
 0x136   : > { %v3487_v46 = vpop.permute.xlu1 %1492  ;;  %v3502_v50 = vor.u32 %v614_v62, %v610_v53 }
 0x137   : > { %4344 = vst [vmem:[#allocation59_spill] sm:$0xff] %v3487_v46  ;;  %v3489_v28 = vpop.permute.xlu0 %1490 }
 0x138   : > { %4345 = vst [vmem:[#allocation60_spill] sm:$0xff] %v3489_v28  ;;  %861 = vrot.lane.b32.xlu1 %v4276_v30, %s2661_s13 }
 0x139   : > { %859 = vrot.lane.b32.xlu0 %v849_v60, %s2661_s13 }
 0x13a   : > { %v3496_v35 = vpop.permute.xlu1 %1511 }
 0x13b   : > { %v3498_v1 = vpop.permute.xlu0 %1509 }
 0x13c   : > { %876 = vrot.lane.b32.xlu1 %v3414_v15, %s4280_s30 }
 0x13d   : > { %874 = vrot.lane.b32.xlu0 %v3395_v11, %s4280_s30  ;;  %v3522_v11 = vcombine.low %v2931_v7, %v2931_v7  ;;  %v4277_v7 = vrot.slane %v3471_v42, 1 }
 0x13e   : > { %v3506_v28 = vpop.permute.xlu1 %1515 }
 0x13f   : > { %4346 = vst [vmem:[#allocation61_spill] sm:$0xff] %v3506_v28  ;;  %v3508_v30 = vpop.permute.xlu0 %1513 }
 0x140   : > { %4347 = vst [vmem:[#allocation62_spill] sm:$0xff] %v3508_v30  ;;  %630 = vrot.lane.b32.xlu1 %v3502_v50, %s2654_s17 }
 0x141   : > { %628 = vrot.lane.b32.xlu0 %v2897_v56, %s2654_s17  ;;  %s4278_s17 = smov 52  }
 0x142   : > { %v3514_v27 = vpop.permute.xlu1 %1537 }
 0x143   : > { %v3516_v46 = vpop.permute.xlu0 %1535 }
 0x144   : > { %643 = vrot.lane.b32.xlu1 %v2960_v22, %s4317_s19 }
 0x145   : > { %641 = vrot.lane.b32.xlu0 %v2941_v8, %s4317_s19 }
 0x146   : > { %v3526_v62 = vpop.permute.xlu1 %1541 }
 0x147   : > { %4348 = vst [vmem:[#allocation63_spill] sm:$0xff] %v3526_v62  ;;  %v3528_v53 = vpop.permute.xlu0 %1539 }
 0x148   : > { %4349 = vst [vmem:[#allocation64_spill] sm:$0xff] %v3528_v53  ;;  %880 = vrot.lane.b32.xlu1 %v3522_v11, %s4280_s30 }
 0x149   : > { %878 = vrot.lane.b32.xlu0 %v3408_v0, %s4280_s30  ;;  %s4378_s30 = smov 36  }
 0x14a   : > { %v3534_v30 = vpop.permute.xlu1 %1556 }
 0x14b   : > { %4350 = vst [vmem:[#allocation65_spill] sm:$0xff] %v3534_v30  ;;  %v3536_v28 = vpop.permute.xlu0 %1554  ;;  %v4359_v30 = vrot.slane %v2953_v17, 1 }
 0x14c   : > { %4351 = vst [vmem:[#allocation66_spill] sm:$0xff] %v3536_v28  ;;  %902 = vrot.lane.b32.xlu1 %v2980_v43, %s4278_s17 }
 0x14d   : > { %900 = vrot.lane.b32.xlu0 %v3422_v58, %s4278_s17 }
 0x14e   : > { %v3543_v8 = vpop.permute.xlu1 %1560 }
 0x14f   : > { %4352 = vst [vmem:[#allocation67_spill] sm:$0xff] %v3543_v8  ;;  %v3545_v53 = vpop.permute.xlu0 %1558 }
 0x150   : > { %4353 = vst [vmem:[#allocation68_spill] sm:$0xff] %v3545_v53  ;;  %647 = vrot.lane.b32.xlu1 %v4277_v7, %s4317_s19  ;;  %v402_v7 = vld [vmem:[%s2792_s14 + $0x48] sm:$0xf] }
 0x151   : > { %645 = vrot.lane.b32.xlu0 %v2958_v21, %s4317_s19  ;;  %s2664_s19 = smov 56  }
 0x152   : > { %v3552_v62 = vpop.permute.xlu1 %1579 }
 0x153   : > { %4354 = vst [vmem:[#allocation69_spill] sm:$0xff] %v3552_v62  ;;  %v3554_v43 = vpop.permute.xlu0 %1577 }
 0x154   : > { %4355 = vst [vmem:[#allocation70_spill] sm:$0xff] %v3554_v43  ;;  %662 = vrot.lane.b32.xlu1 %v2270_v16, %s4308_s29  ;;  %v2273_v16 = vcombine.low %v402_v7, %v402_v7 }
 0x155   : > { %660 = vrot.lane.b32.xlu0 %v3434_v33, %s4308_s29  ;;  %v4358_v33 = vrot.slane %v3384_v37, 1 }
 0x156   : > { %v3559_v58 = vpop.permute.xlu1 %1583 }
 0x157   : > { %4356 = vst [vmem:[#allocation71_spill] sm:$0xff] %v3559_v58  ;;  %v3561_v53 = vpop.permute.xlu0 %1581 }
 0x158   : > { %4357 = vst [vmem:[#allocation72_spill] sm:$0xff] %v3561_v53  ;;  %906 = vrot.lane.b32.xlu1 %v2988_v54, %s4278_s17  ;;  %v403_v53 = vld [vmem:[%s2792_s14 + $0x4c] sm:$0x1] }
 0x159   : > { %904 = vrot.lane.b32.xlu0 %v2976_v38, %s4278_s17  ;;  %v3581_v28 = vcombine.low %v402_v7, %v403_v53  ;;  %v2535_v38 = vld [vmem:[%s4248_s3] sm:$0xff]   ;;  %s2665_s17 = smov 60  }
 0x15a   : > { %v3568_v8 = vpop.permute.xlu1 %592  ;;  %2347 = vmatprep.subr.bf16.mxu0 %v2535_v38  ;;  %2369 = vmatprep.subr.bf16.mxu1 %v2535_v38 }
 0x15b   : > { %v3570_v62 = vpop.permute.xlu0 %590  ;;  %2348 = vmatpush3.bf16.msra.mxu0 %v2535_v38  ;;  %2376 = vmatpush3.bf16.msra.mxu1 %v2535_v38  ;;  %v674_v7 = vshll.u32 %v3581_v28, 16 }
 0x15c   : > { %919 = vrot.lane.b32.xlu1 %v849_v60, %s2664_s19 }
 0x15d   : > { %917 = vrot.lane.b32.xlu0 %v4358_v33, %s2664_s19  ;;  %v1586_v33 = vsel %vm952_vm0, %v2926_v2, %v3213_v40  ;;  %v672_v2 = vshrl.u32 %v3581_v28, 16  ;;  %v676_v40 = vrot.slane %v674_v7, 1 }
 0x15e   : > { %v3577_v58 = vpop.permute.xlu1 %596 }
 0x15f   : > { %v3579_v43 = vpop.permute.xlu0 %594 }
 0x160   : > { %666 = vrot.lane.b32.xlu1 %v2273_v16, %s4308_s29  ;;  %v2536_v16 = vld [vmem:[%s4248_s3 + $0x8] sm:$0xff]  }
 0x161   : > { %664 = vrot.lane.b32.xlu0 %v3461_v3, %s4308_s29  ;;  %v1588_v3 = vsel %vm952_vm0, %v2918_v63, %v3211_v44  ;;  %2349 = vmatprep.subr.bf16.mxu0 %v2536_v16  ;;  %v1602_v44 = vsel %vm977_vm2, %v1586_v33, %v3230_v4  ;;  %s2666_s29 = smov 64  }
 0x162   : > { %v3589_v60 = vpop.permute.xlu1 %618  ;;  %2370 = vmatprep.subr.bf16.mxu1 %v2536_v16  ;;  %v1604_v38 = vsel %vm977_vm2, %v1588_v3, %v3228_v23  ;;  %2350 = vmatpush3.bf16.msra.mxu0 %v2536_v16  ;;  %v2537_v23 = vld [vmem:[%s4248_s3 + $0x10] sm:$0xff]  }
 0x163   : > { %v3591_v37 = vpop.permute.xlu0 %616  ;;  %2377 = vmatpush3.bf16.msra.mxu1 %v2536_v16  ;;  %v1620_v53 = vsel %vm994_vm1, %v1604_v38, %v3242_v48  ;;  %v1618_v16 = vsel %vm994_vm1, %v1602_v44, %v3244_v25  ;;  %v4360_v48 = vrot.slane %v2918_v63, 1  ;;  %2351 = vmatprep.subr.bf16.mxu0 %v2537_v23 }
 0x164   : > { %688 = vrot.lane.b32.xlu1 %v2897_v56, %s4309_s20  ;;  %v1636_v4 = vsel %vm1011_vm3, %v1620_v53, %v3257_v41  ;;  %2371 = vmatprep.subr.bf16.mxu1 %v2537_v23 }
 0x165   : > { %686 = vrot.lane.b32.xlu0 %v2902_v57, %s4309_s20  ;;  %v1652_v7 = vsel %vm1028_vm4, %v1636_v4, %v3272_v26  ;;  %v2540_v4 = vld [vmem:[%s4248_s3 + $0x28] sm:$0xff]  }
 0x166   : > { %v3605_v56 = vpop.permute.xlu1 %622  ;;  %v1668_v41 = vsel %vm1045_vm5, %v1652_v7, %v3286_v49  ;;  %2352 = vmatpush3.bf16.msra.mxu0 %v2537_v23  ;;  %v2538_v49 = vld [vmem:[%s4248_s3 + $0x18] sm:$0xff]  }
 0x167   : > { %v3612_v57 = vpop.permute.xlu0 %620  ;;  %2378 = vmatpush3.bf16.msra.mxu1 %v2537_v23  ;;  %v1684_v26 = vsel %vm1062_vm6, %v1668_v41, %v3306_v5  ;;  %2353 = vmatprep.subr.bf16.mxu0 %v2538_v49  ;;  %v4361_v7 = vld [vmem:[#allocation15_spill] sm:$0xff]  ;;  %v4362_v41 = vld [vmem:[#allocation16_spill] sm:$0xff] }
 0x168   : > { %923 = vrot.lane.b32.xlu1 %v4359_v30, %s2664_s19  ;;  %v1634_v30 = vsel %vm1011_vm3, %v1618_v16, %v3259_v51  ;;  %v1700_v33 = vsel %vm1079_vm7, %v1684_v26, %v3320_v20  ;;  %2372 = vmatprep.subr.bf16.mxu1 %v2538_v49  ;;  %v4363_v26 = vld [vmem:[#allocation27_spill] sm:$0xff] }
 0x169   : > { %921 = vrot.lane.b32.xlu0 %v4360_v48, %s2664_s19  ;;  %v1650_v25 = vsel %vm1028_vm4, %v1634_v30, %v3274_v52  ;;  %v677_v52 = vor.u32 %v676_v40, %v672_v2  ;;  %v1716_v5 = vsel %vm1096_vm8, %v1700_v33, %v3345_v36  ;;  %v2539_v36 = vld [vmem:[%s4248_s3 + $0x20] sm:$0xff]   ;;  %v2545_v30 = vld [vmem:[%s2792_s14 + $0x18] sm:$0xf] }
 0x16a   : > { %v3636_v3 = vpop.permute.xlu1 %635  ;;  %v1666_v51 = vsel %vm1045_vm5, %v1650_v25, %v3288_v32  ;;  %2354 = vmatpush3.bf16.msra.mxu0 %v2538_v49  ;;  %v2544_v48 = vld [vmem:[%s2792_s14] sm:$0xf]  ;;  %v2546_v25 = vld [vmem:[%s2792_s14 + $0x8] sm:$0xf] }
 0x16b   : > { %v3642_v63 = vpop.permute.xlu0 %633  ;;  %v1682_v53 = vsel %vm1062_vm6, %v1666_v51, %v3308_v34  ;;  %v3669_v34 = vsel %vm1113_vm9, %v1716_v5, %v3376_v47  ;;  %2379 = vmatpush3.bf16.msra.mxu1 %v2538_v49  ;;  %v1590_v47 = vsel %vm952_vm0, %v2953_v17, %v3221_v6  ;;  %2355 = vmatprep.subr.bf16.mxu0 %v2539_v36  ;;  %v4367_v5 = vld [vmem:[#allocation30_spill] sm:$0xff] }
 0x16c   : > { %938 = vrot.lane.b32.xlu1 %v3408_v0, %s2665_s17  ;;  %v1698_v32 = vsel %vm1079_vm7, %v1682_v53, %v3322_v9  ;;  %2373 = vmatprep.subr.bf16.mxu1 %v2539_v36  ;;  %v958_v51 = vsel %vm952_vm0, %v2546_v25, %v4362_v41  ;;  %v4374_v25 = vld [vmem:[#allocation46_spill] sm:$0xff] }
 0x16d   : > { %936 = vrot.lane.b32.xlu0 %v3414_v15, %s2665_s17  ;;  %v1714_v38 = vsel %vm1096_vm8, %v1698_v32, %v3347_v13  ;;  %v1592_v13 = vsel %vm952_vm0, %v2944_v14, %v3219_v29  ;;  %v1753_v15 = vshll.u32 %v3669_v34, 16  ;;  %v1606_v29 = vsel %vm977_vm2, %v1590_v47, %v3237_v12  ;;  %v4366_v32 = vld [vmem:[#allocation29_spill] sm:$0xff]  ;;  %v4368_v47 = vld [vmem:[#allocation31_spill] sm:$0xff] }
 0x16e   : > { %v3663_v0 = vpop.permute.xlu1 %639  ;;  %v3675_v9 = vsel %vm1113_vm9, %v1714_v38, %v3379_v31  ;;  %v1608_v31 = vsel %vm977_vm2, %v1592_v13, %v3235_v24  ;;  %2356 = vmatpush3.bf16.msra.mxu0 %v2539_v36  ;;  %v2542_v24 = vld [vmem:[%s2792_s14 + $0x10] sm:$0xf]  ;;  %v1622_v23 = vsel %vm994_vm1, %v1606_v29, %v3251_v61  ;;  %v964_v61 = vsel %vm952_vm0, %v2545_v30, %v4361_v7 }
 0x16f   : > { %v3671_v20 = vpop.permute.xlu0 %637  ;;  %v1747_v6 = vshll.u32 %v3675_v9, 16  ;;  %2380 = vmatpush3.bf16.msra.mxu1 %v2539_v36  ;;  %v961_v40 = vsel %vm952_vm0, %v2542_v24, %v3141_v55  ;;  %v955_v55 = vsel %vm952_vm0, %v2544_v48, %v3143_v59  ;;  %v1755_v53 = vrot.slane %v1753_v15, 1  ;;  %2357 = vmatprep.subr.bf16.mxu0 %v2540_v4  ;;  %v4369_v15 = vld [vmem:[#allocation34_spill] sm:$0xff] }
 0x170   : > { %692 = vrot.lane.b32.xlu1 %v677_v52, %s4309_s20  ;;  %v4364_v52 = vld [vmem:[#allocation28_spill] sm:$0xff]  ;;  %2374 = vmatprep.subr.bf16.mxu1 %v2540_v4  ;;  %v2541_v24 = vld [vmem:[%s4248_s3 + $0x30] sm:$0x3f]   ;;  %v1745_v30 = vshrl.u32 %v3675_v9, 16 }
 0x171   : > { %690 = vrot.lane.b32.xlu0 %v3502_v50, %s4309_s20  ;;  %v1624_v50 = vsel %vm994_vm1, %v1608_v31, %v3249_v39  ;;  %v2543_v39 = vld [vmem:[%s2893_s12 + $0x28] sm:$0xf]  ;;  %v1749_v36 = vrot.slane %v1747_v6, 1  ;;  %v4370_v6 = vld [vmem:[#allocation22_spill] sm:$0xff] }
 0x172   : > { %v3692_v44 = vpop.permute.xlu1 %654  ;;  %v1640_v12 = vsel %vm1011_vm3, %v1624_v50, %v3264_v18  ;;  %v3711_v16 = vcombine.low %v2543_v39, %v2543_v39  ;;  %v1638_v18 = vsel %vm1011_vm3, %v1622_v23, %v3266_v10  ;;  %v4365_v10 = vld [vmem:[#allocation21_spill] sm:$0xff]  ;;  %2358 = vmatpush3.bf16.msra.mxu0 %v2540_v4  ;;  %v1751_v50 = vshrl.u32 %v3669_v34, 16 }
 0x173   : > { %v3699_v2 = vpop.permute.xlu0 %652  ;;  %v1654_v59 = vsel %vm1028_vm4, %v1638_v18, %v4363_v26  ;;  %2381 = vmatpush3.bf16.msra.mxu1 %v2540_v4  ;;  %v983_v23 = vsel %vm977_vm2, %v961_v40, %v4370_v6  ;;  %v4372_v4 = vld [vmem:[#allocation40_spill] sm:$0xff]  ;;  %v4373_v34 = vld [vmem:[#allocation41_spill] sm:$0xff]  ;;  %2383 = vmatprep.subr.msk.bf16.mxu0 %vm1921_vm10, %v2541_v24  ;;  %v1750_v40 = vor.u32 %v1749_v36, %v1745_v30  ;;  %v2547_v30 = vld [vmem:[%s2893_s12 + $0x38] sm:$0xf] }
 0x174   : > { %705 = vrot.lane.b32.xlu1 %v2958_v21, %s2658_s18  ;;  %v1656_v21 = vsel %vm1028_vm4, %v1640_v12, %v3278_v19  ;;  %v985_v19 = vsel %vm977_vm2, %v964_v61, %v4365_v10  ;;  %v4371_v12 = vld [vmem:[#allocation35_spill] sm:$0xff]  ;;  %v1756_v61 = vor.u32 %v1755_v53, %v1751_v50  ;;  %2384 = vmatprep.subr.msk.bf16.mxu1 %vm1921_vm10, %v2541_v24  ;;  %v694_v10 = vrot.slane %v3581_v28, 1 }
 0x175   : > { %703 = vrot.lane.b32.xlu0 %v2960_v22, %s2658_s18  ;;  %v1672_v49 = vsel %vm1045_vm5, %v1656_v21, %v4364_v52  ;;  %v1670_v22 = vsel %vm1045_vm5, %v1654_v59, %v4366_v32  ;;  %v1002_v9 = vsel %vm994_vm1, %v985_v19, %v3577_v58  ;;  %v1923_v59 = vsel %vm1921_vm10, %v2541_v24, 0  ;;  %v4375_v52 = vld [vmem:[#allocation14_spill] sm:$0xff]  ;;  %v4376_v58 = vld [vmem:[#allocation13_spill] sm:$0xff] }
 0x176   : > { %v659_v33 = vpop.permute.xlu1 %658  ;;  %v1688_v38 = vsel %vm1062_vm6, %v1672_v49, %v4367_v5  ;;  %v1686_v31 = vsel %vm1062_vm6, %v1670_v22, %v4368_v47  ;;  %v979_v49 = vsel %vm977_vm2, %v955_v55, %v4375_v52  ;;  %v1019_v53 = vsel %vm1011_vm3, %v1002_v9, %v3605_v56  ;;  %2360 = vmatpush3.bf16.msra.mxu0 %v1923_v59 }
 0x177   : > { %v657_v13 = vpop.permute.xlu0 %656  ;;  %v1704_v29 = vsel %vm1079_vm7, %v1688_v38, %v4369_v15  ;;  %v1702_v39 = vsel %vm1079_vm7, %v1686_v31, %v4371_v12  ;;  %v981_v19 = vsel %vm977_vm2, %v958_v51, %v4376_v58  ;;  %v1036_v55 = vsel %vm1028_vm4, %v1019_v53, %v3663_v0  ;;  %2382 = vmatpush3.bf16.msra.mxu1 %v1923_v59  ;;  %v4379_v59 = vld [vmem:[#allocation5_spill] sm:$0xff]  ;;  %v4381_v58 = vld [vmem:[#allocation10_spill] sm:$0xff] }
 0x178   : > { %942 = vrot.lane.b32.xlu1 %v3711_v16, %s2665_s17  ;;  %v1720_v48 = vsel %vm1096_vm8, %v1704_v29, %v4372_v4  ;;  %v1718_v7 = vsel %vm1096_vm8, %v1702_v39, %v4373_v34  ;;  %v998_v56 = vsel %vm994_vm1, %v981_v19, %v3568_v8  ;;  %v1053_v5 = vsel %vm1045_vm5, %v1036_v55, %v659_v33 }
 0x179   : > { %940 = vrot.lane.b32.xlu0 %v3522_v11, %s2665_s17  ;;  %v1736_v18 = vsel %vm1113_vm9, %v1720_v48, %v3416_v45  ;;  %v1734_v41 = vsel %vm1113_vm9, %v1718_v7, %v4374_v25  ;;  %v1000_v45 = vsel %vm994_vm1, %v983_v23, %v3579_v43  ;;  %v996_v51 = vsel %vm994_vm1, %v979_v49, %v3570_v62  ;;  %v2548_v7 = vld [vmem:[%s2893_s12 + $0x30] sm:$0xf] }
 0x17a   : > { %v681_v21 = vpop.permute.xlu1 %680  ;;  %v1765_v32 = vshll.u32 %v1736_v18, 16  ;;  %v1017_v22 = vsel %vm1011_vm3, %v1000_v45, %v3612_v57  ;;  %v1759_v43 = vshll.u32 %v1734_v41, 16  ;;  %v1015_v57 = vsel %vm1011_vm3, %v998_v56, %v3589_v60  ;;  %v4384_v56 = vld [vmem:[#allocation7_spill] sm:$0xff] }
 0x17b   : > { %v679_v26 = vpop.permute.xlu0 %678  ;;  %v1034_v28 = vsel %vm1028_vm4, %v1017_v22, %v3671_v20  ;;  %v1013_v8 = vsel %vm1011_vm3, %v996_v51, %v3591_v37  ;;  %v1032_v20 = vsel %vm1028_vm4, %v1015_v57, %v3636_v3  ;;  %v3824_v34 = vcombine.low %v2547_v30, %v2547_v30  ;;  %v4392_v30 = vld [vmem:[#allocation20_spill] sm:$0xff] }
 0x17c   : > { %1795 = vrot.lane.b32.xlu1 %v1756_v61, %s2666_s29  ;;  %v1051_v0 = vsel %vm1045_vm5, %v1034_v28, %v657_v13  ;;  %v1030_v62 = vsel %vm1028_vm4, %v1013_v8, %v3642_v63  ;;  %v1049_v60 = vsel %vm1045_vm5, %v1032_v20, %v3692_v44  ;;  %v4377_v13 = vrot.slane %v3471_v42, 1  ;;  %v2549_v8 = vld [vmem:[%s2893_s12 + $0x40] sm:$0xf] }
 0x17d   : > { %1793 = vrot.lane.b32.xlu0 %v1750_v40, %s2666_s29  ;;  %v1767_v31 = vrot.slane %v1765_v32, 1  ;;  %v1047_v37 = vsel %vm1045_vm5, %v1030_v62, %v3699_v2  ;;  %v1066_v3 = vsel %vm1062_vm6, %v1049_v60, %v681_v21  ;;  %v1761_v29 = vrot.slane %v1759_v43, 1  ;;  %v2550_v60 = vld [vmem:[%s2792_s14 + $0x28] sm:$0xf] }
 0x17e   : > { %v685_v38 = vpop.permute.xlu1 %684  ;;  %v1064_v50 = vsel %vm1062_vm6, %v1047_v37, %v679_v26  ;;  %v1763_v44 = vshrl.u32 %v1736_v18, 16  ;;  %v1757_v42 = vshrl.u32 %v1734_v41, 16  ;;  %v3828_v61 = vcombine.low %v2548_v7, %v2548_v7  ;;  %v2551_v37 = vld [vmem:[%s2792_s14 + $0x20] sm:$0xf] }
 0x17f   : > { %v1070_v36 = vsel %vm1062_vm6, %v1053_v5, %v685_v38  ;;  %v683_v47 = vpop.permute.xlu0 %682  ;;  %v852_v32 = vrot.slane %v2944_v14, 1  ;;  %v4383_v43 = vrot.slane %v2953_v17, 1  ;;  %v853_v28 = vrot.slane %v4384_v56, 1 }
 0x180   : > { %v1068_v33 = vsel %vm1062_vm6, %v1051_v0, %v683_v47  ;;  %709 = vrot.lane.b32.xlu1 %v694_v10, %s2658_s18  ;;  %v1768_v2 = vor.u32 %v1767_v31, %v1763_v44  ;;  %v1762_v12 = vor.u32 %v1761_v29, %v1757_v42  ;;  %v4380_v10 = vld [vmem:[#allocation8_spill] sm:$0xff]  ;;  %v3874_v20 = vcombine.low %v2549_v8, %v2549_v8  ;;  %v4388_v29 = vld [vmem:[#allocation23_spill] sm:$0xff] }
 0x181   : > { %707 = vrot.lane.b32.xlu0 %v4377_v13, %s2658_s18  ;;  %s4385_s18 = smov 48   ;;  %v4386_v13 = vld [vmem:[#allocation17_spill] sm:$0xff]  ;;  %v4402_v8 = vld [vmem:[#allocation12_spill] sm:$0xff] }
 0x182   : > { %v698_v15 = vpop.permute.xlu1 %697  ;;  %v970_v31 = vsel %vm952_vm0, %v2550_v60, %v4386_v13  ;;  %v4403_v60 = vld [vmem:[#allocation37_spill] sm:$0xff] }
 0x183   : > { %v1083_v63 = vsel %vm1079_vm7, %v1066_v3, %v698_v15  ;;  %v696_v24 = vpop.permute.xlu0 %695  ;;  %v4387_v3 = vld [vmem:[#allocation18_spill] sm:$0xff] }
 0x184   : > { %v1081_v6 = vsel %vm1079_vm7, %v1064_v50, %v696_v24  ;;  %745 = vrot.lane.b32.xlu1 %v3711_v16, %s4378_s30  ;;  %v967_v15 = vsel %vm952_vm0, %v2551_v37, %v4387_v3  ;;  %v4389_v50 = vld [vmem:[#allocation24_spill] sm:$0xff]  ;;  %v4406_v3 = vld [vmem:[#allocation45_spill] sm:$0xff] }
 0x185   : > { %743 = vrot.lane.b32.xlu0 %v3522_v11, %s4378_s30 }
 0x186   : > { %v702_v23 = vpop.permute.xlu1 %701 }
 0x187   : > { %v1087_v39 = vsel %vm1079_vm7, %v1070_v36, %v702_v23  ;;  %v700_v4 = vpop.permute.xlu0 %699 }
 0x188   : > { %v1085_v48 = vsel %vm1079_vm7, %v1068_v33, %v700_v4  ;;  %1799 = vrot.lane.b32.xlu1 %v1768_v2, %s2666_s29 }
 0x189   : > { %1797 = vrot.lane.b32.xlu0 %v1762_v12, %s2666_s29  ;;  %v2552_v12 = vld [vmem:[%s2792_s14 + $0x38] sm:$0xf] }
 0x18a   : > { %v738_v18 = vpop.permute.xlu1 %737 }
 0x18b   : > { %v1100_v11 = vsel %vm1096_vm8, %v1083_v63, %v738_v18  ;;  %v736_v21 = vpop.permute.xlu0 %735  ;;  %v987_v63 = vsel %vm977_vm2, %v967_v15, %v4389_v50  ;;  %v4393_v18 = vld [vmem:[#allocation25_spill] sm:$0xff] }
 0x18c   : > { %v1098_v40 = vsel %vm1096_vm8, %v1081_v6, %v736_v21  ;;  %749 = vrot.lane.b32.xlu1 %v3824_v34, %s4378_s30  ;;  %v4394_v21 = vld [vmem:[#allocation32_spill] sm:$0xff] }
 0x18d   : > { %747 = vrot.lane.b32.xlu0 %v3828_v61, %s4378_s30 }
 0x18e   : > { %v742_v25 = vpop.permute.xlu1 %741 }
 0x18f   : > { %v1104_v41 = vsel %vm1096_vm8, %v1087_v39, %v742_v25  ;;  %v740_v9 = vpop.permute.xlu0 %739  ;;  %v4391_v39 = vld [vmem:[#allocation19_spill] sm:$0xff] }
 0x190   : > { %v1102_v26 = vsel %vm1096_vm8, %v1085_v48, %v740_v9  ;;  %841 = vrot.lane.b32.xlu1 %v4379_v59, %s2660_s9  ;;  %v976_v4 = vsel %vm952_vm0, %v2552_v12, %v4391_v39  ;;  %v2553_v48 = vld [vmem:[%s2792_s14 + $0x30] sm:$0xf]  ;;  %s377_s14 = scalar_select %p376_p2, %s2633_s24, 7 }
 0x191   : > { %839 = vrot.lane.b32.xlu0 %v2988_v54, %s2660_s9  ;;  %v4382_v54 = vld [vmem:[#allocation6_spill] sm:$0xff]  ;;  %v973_v7 = vsel %vm952_vm0, %v2553_v48, %v4392_v30  ;;  %v4413_v30 = vld [vmem:[#allocation51_spill] sm:$0xff] }
 0x192   : > { %v834_v52 = vpop.permute.xlu1 %833  ;;  %v854_v55 = vrot.slane %v4382_v54, 1 }
 0x193   : > { %v1117_v49 = vsel %vm1113_vm9, %v1100_v11, %v834_v52  ;;  %v832_v45 = vpop.permute.xlu0 %831  ;;  %v993_v11 = vsel %vm977_vm2, %v976_v4, %v4393_v18  ;;  %v4412_v4 = vld [vmem:[#allocation48_spill] sm:$0xff] }
 0x194   : > { %v1115_v53 = vsel %vm1113_vm9, %v1098_v40, %v832_v45  ;;  %845 = vrot.lane.b32.xlu1 %v4380_v10, %s2660_s9  ;;  %v1596_v40 = vsel %vm952_vm0, %v4382_v54, %v4394_v21  ;;  %v4415_v21 = vld [vmem:[#allocation57_spill] sm:$0xff] }
 0x195   : > { %843 = vrot.lane.b32.xlu0 %v4381_v58, %s2660_s9  ;;  %s2254_s9 = sshll.u32 %s2777_s16, 6  ;;  %s340_s16 = sand.u32 1, %s2625_s22  }
 0x196   : > { %v601_v19 = vpop.permute.xlu1 %600 }
 0x197   : > { %v599_v22 = vpop.permute.xlu0 %598 }
 0x198   : > { %865 = vrot.lane.b32.xlu1 %v852_v32, %s2661_s13  ;;  %v1004_v6 = vsel %vm994_vm1, %v987_v63, %v599_v22  ;;  %v4409_v63 = vld [vmem:[#allocation47_spill] sm:$0xff] }
 0x199   : > { %863 = vrot.lane.b32.xlu0 %v4383_v43, %s2661_s13  ;;  %v4400_v43 = vld [vmem:[#allocation39_spill] sm:$0xff] }
 0x19a   : > { %v838_v5 = vpop.permute.xlu1 %837 }
 0x19b   : > { %v1121_v38 = vsel %vm1113_vm9, %v1104_v41, %v838_v5  ;;  %v836_v51 = vpop.permute.xlu0 %835  ;;  %v4395_v41 = vld [vmem:[#allocation26_spill] sm:$0xff] }
 0x19c   : > { %v1119_v57 = vsel %vm1113_vm9, %v1102_v26, %v836_v51  ;;  %869 = vrot.lane.b32.xlu1 %v854_v55, %s2661_s13  ;;  %v991_v9 = vsel %vm977_vm2, %v973_v7, %v4395_v41  ;;  %v4396_v26 = vld [vmem:[#allocation33_spill] sm:$0xff]  ;;  %v4401_v51 = vld [vmem:[#allocation44_spill] sm:$0xff]  ;;  %v4414_v7 = vld [vmem:[#allocation54_spill] sm:$0xff] }
 0x19d   : > { %867 = vrot.lane.b32.xlu0 %v853_v28, %s2661_s13  ;;  %s4390_s13 = smov 52   ;;  %v1594_v52 = vsel %vm952_vm0, %v4384_v56, %v4396_v26  ;;  %v4416_v41 = vld [vmem:[#allocation52_spill] sm:$0xff] }
 0x19e   : > { %v858_v17 = vpop.permute.xlu1 %857  ;;  %v1610_v5 = vsel %vm977_vm2, %v1594_v52, %v4400_v43  ;;  %v4417_v52 = vld [vmem:[#allocation58_spill] sm:$0xff] }
 0x19f   : > { %v3866_v0 = vsel %vm1130_vm11, %v1117_v49, %v858_v17  ;;  %v856_v36 = vpop.permute.xlu0 %855  ;;  %v1626_v15 = vsel %vm994_vm1, %v1610_v5, %v4406_v3 }
 0x1a0   : > { %v3869_v47 = vsel %vm1130_vm11, %v1115_v53, %v856_v36  ;;  %884 = vrot.lane.b32.xlu1 %v3828_v61, %s4385_s18 }
 0x1a1   : > { %882 = vrot.lane.b32.xlu0 %v3711_v16, %s4385_s18  ;;  %v989_v16 = vsel %vm977_vm2, %v970_v31, %v4388_v29  ;;  %v4405_v31 = vld [vmem:[#allocation42_spill] sm:$0xff]  ;;  %v4407_v29 = vld [vmem:[#allocation49_spill] sm:$0xff] }
 0x1a2   : > { %v3878_v33 = vpop.permute.xlu1 %604  ;;  %v1006_v24 = vsel %vm994_vm1, %v989_v16, %v601_v19  ;;  %v4399_v19 = vld [vmem:[#allocation9_spill] sm:$0xff] }
 0x1a3   : > { %v3880_v62 = vpop.permute.xlu0 %602 }
 0x1a4   : > { %888 = vrot.lane.b32.xlu1 %v3874_v20, %s4385_s18 }
 0x1a5   : > { %886 = vrot.lane.b32.xlu0 %v3824_v34, %s4385_s18 }
 0x1a6   : > { %v627_v44 = vpop.permute.xlu1 %626 }
 0x1a7   : > { %v3899_v42 = vsel %vm1011_vm3, %v1006_v24, %v627_v44  ;;  %v625_v2 = vpop.permute.xlu0 %624  ;;  %v4410_v44 = vld [vmem:[#allocation50_spill] sm:$0xff] }
 0x1a8   : > { %v3902_v23 = vsel %vm1011_vm3, %v1004_v6, %v625_v2  ;;  %910 = vrot.lane.b32.xlu1 %v4381_v58, %s4390_s13  ;;  %v4398_v58 = vld [vmem:[#allocation36_spill] sm:$0xff]  ;;  %v1642_v6 = vsel %vm1011_vm3, %v1626_v15, %v4410_v44  ;;  %v4411_v2 = vld [vmem:[#allocation53_spill] sm:$0xff]  ;;  %v4430_v44 = vld [vmem:[#allocation67_spill] sm:$0xff] }
 0x1a9   : > { %908 = vrot.lane.b32.xlu0 %v4379_v59, %s4390_s13  ;;  %v4397_v59 = vld [vmem:[#allocation38_spill] sm:$0xff]  ;;  %v1600_v22 = vsel %vm952_vm0, %v4399_v19, %v4398_v58  ;;  %v1658_v18 = vsel %vm1028_vm4, %v1642_v6, %v4414_v7  ;;  %v4418_v58 = vld [vmem:[#allocation55_spill] sm:$0xff]  ;;  %v4425_v15 = vld [vmem:[#allocation61_spill] sm:$0xff] }
 0x1aa   : > { %v862_v25 = vpop.permute.xlu1 %861  ;;  %v1612_v49 = vsel %vm977_vm2, %v1596_v40, %v4397_v59  ;;  %v1616_v37 = vsel %vm977_vm2, %v1600_v22, %v4405_v31  ;;  %v1674_v59 = vsel %vm1045_vm5, %v1658_v18, %v4417_v52  ;;  %v4419_v22 = vld [vmem:[#allocation56_spill] sm:$0xff] }
 0x1ab   : > { %v3927_v45 = vsel %vm1130_vm11, %v1121_v38, %v862_v25  ;;  %v860_v53 = vpop.permute.xlu0 %859  ;;  %v1628_v17 = vsel %vm994_vm1, %v1612_v49, %v4401_v51  ;;  %v4404_v38 = vld [vmem:[#allocation11_spill] sm:$0xff]  ;;  %v1632_v24 = vsel %vm994_vm1, %v1616_v37, %v4409_v63  ;;  %v1690_v5 = vsel %vm1062_vm6, %v1674_v59, %v3498_v1  ;;  %v4429_v63 = vld [vmem:[#allocation64_spill] sm:$0xff] }
 0x1ac   : > { %v3937_v36 = vsel %vm1130_vm11, %v1119_v57, %v860_v53  ;;  %914 = vrot.lane.b32.xlu1 %v4402_v8, %s4390_s13  ;;  %v1598_v13 = vsel %vm952_vm0, %v4404_v38, %v4403_v60  ;;  %v1644_v16 = vsel %vm1011_vm3, %v1628_v17, %v4407_v29  ;;  %v4408_v57 = vld [vmem:[#allocation43_spill] sm:$0xff]  ;;  %v916_v53 = vrot.slane %v4404_v38, 1  ;;  %v4421_v17 = vld [vmem:[#allocation65_spill] sm:$0xff]  ;;  %v4422_v38 = vld [vmem:[#allocation66_spill] sm:$0xff] }
 0x1ad   : > { %912 = vrot.lane.b32.xlu0 %v4380_v10, %s4390_s13  ;;  %v1614_v50 = vsel %vm977_vm2, %v1598_v13, %v4408_v57  ;;  %v1660_v12 = vsel %vm1028_vm4, %v1644_v16, %v4411_v2  ;;  %v1648_v10 = vsel %vm1011_vm3, %v1632_v24, %v4413_v30  ;;  %v1010_v60 = vsel %vm994_vm1, %v993_v11, %v3878_v33  ;;  %v4423_v13 = vld [vmem:[#allocation69_spill] sm:$0xff]  ;;  %v4426_v33 = vld [vmem:[#allocation70_spill] sm:$0xff] }
 0x1ae   : > { %v3960_v39 = vpop.permute.xlu1 %876  ;;  %v1630_v48 = vsel %vm994_vm1, %v1614_v50, %v4412_v4  ;;  %v1676_v40 = vsel %vm1045_vm5, %v1660_v12, %v4415_v21  ;;  %v1664_v19 = vsel %vm1028_vm4, %v1648_v10, %v4418_v58  ;;  %v4427_v57 = vld [vmem:[#allocation62_spill] sm:$0xff]  ;;  %v4431_v4 = vld [vmem:[#allocation68_spill] sm:$0xff]  ;;  %v4432_v10 = vld [vmem:[#allocation71_spill] sm:$0xff]  ;;  %vm1809_vm0 = vcmask 523264  }
 0x1af   : > { %v3970_v25 = vpop.permute.xlu0 %874  ;;  %v1646_v26 = vsel %vm1011_vm3, %v1630_v48, %v4416_v41  ;;  %v1692_v49 = vsel %vm1062_vm6, %v1676_v40, %v3496_v35  ;;  %v4420_v35 = vld [vmem:[#allocation59_spill] sm:$0xff]  ;;  %v2554_v41 = vld [vmem:[%s2893_s12 + $0x48] sm:$0xf]  ;;  %s2253_s12 = sshll.u32 %s377_s14, 3  ;;  %s2249_s14 = sshll.u32 %s340_s16, 1 }
 0x1b0   : > { %927 = vrot.lane.b32.xlu1 %v853_v28, %s2664_s19  ;;  %v1662_v43 = vsel %vm1028_vm4, %v1646_v26, %v4419_v22  ;;  %v1708_v51 = vsel %vm1079_vm7, %v1692_v49, %v3514_v27  ;;  %v1680_v56 = vsel %vm1045_vm5, %v1664_v19, %v4420_v35  ;;  %v1706_v28 = vsel %vm1079_vm7, %v1690_v5, %v3516_v46  ;;  %v4424_v46 = vld [vmem:[#allocation60_spill] sm:$0xff] }
 0x1b1   : > { %925 = vrot.lane.b32.xlu0 %v852_v32, %s2664_s19  ;;  %v1724_v8 = vsel %vm1096_vm8, %v1708_v51, %v4421_v17  ;;  %v1722_v27 = vsel %vm1096_vm8, %v1706_v28, %v4422_v38  ;;  %v1008_v32 = vsel %vm994_vm1, %v991_v9, %v3880_v62  ;;  %v1678_v3 = vsel %vm1045_vm5, %v1662_v43, %v4424_v46  ;;  %v4428_v9 = vld [vmem:[#allocation63_spill] sm:$0xff] }
 0x1b2   : > { %v631_v1 = vpop.permute.xlu1 %630  ;;  %v1740_v14 = vsel %vm1113_vm9, %v1724_v8, %v4423_v13  ;;  %v1696_v29 = vsel %vm1062_vm6, %v1680_v56, %v4425_v15  ;;  %v1738_v11 = vsel %vm1113_vm9, %v1722_v27, %v4426_v33  ;;  %v1694_v62 = vsel %vm1062_vm6, %v1678_v3, %v4427_v57 }
 0x1b3   : > { %v1027_v31 = vsel %vm1011_vm3, %v1010_v60, %v631_v1  ;;  %v629_v37 = vpop.permute.xlu0 %628  ;;  %v1712_v50 = vsel %vm1079_vm7, %v1696_v29, %v4428_v9  ;;  %v1710_v24 = vsel %vm1079_vm7, %v1694_v62, %v4429_v63  ;;  %v1777_v2 = vshll.u32 %v1740_v14, 16 }
 0x1b4   : > { %v1025_v16 = vsel %vm1011_vm3, %v1008_v32, %v629_v37  ;;  %931 = vrot.lane.b32.xlu1 %v916_v53, %s2664_s19  ;;  %v1728_v6 = vsel %vm1096_vm8, %v1712_v50, %v4430_v44  ;;  %v1726_v48 = vsel %vm1096_vm8, %v1710_v24, %v4431_v4  ;;  %v1771_v30 = vshll.u32 %v1738_v11, 16 }
 0x1b5   : > { %929 = vrot.lane.b32.xlu0 %v854_v55, %s2664_s19  ;;  %v1744_v7 = vsel %vm1113_vm9, %v1728_v6, %v4432_v10  ;;  %v4433_v55 = vld [vmem:[#allocation72_spill] sm:$0xff]  ;;  %v2293_v26 = vcombine.low %v2554_v41, %v2554_v41  ;;  %v1779_v52 = vrot.slane %v1777_v2, 1  ;;  %v1775_v19 = vshrl.u32 %v1740_v14, 16  ;;  %s380_s19 = sadd.s32 %s2254_s9, %s2253_s12  ;;  %s2332_s12 = sshll.u32 %s2637_s25, 3 }
 0x1b6   : > { %v644_v12 = vpop.permute.xlu1 %643  ;;  %v1742_v21 = vsel %vm1113_vm9, %v1726_v48, %v4433_v55  ;;  %v1789_v59 = vshll.u32 %v1744_v7, 16  ;;  %v1787_v35 = vshrl.u32 %v1744_v7, 16  ;;  %v1149_v55 = vsel %vm1147_vm12, %v3869_v47, %v3970_v25  ;;  %s2076_s9 = sadd.s32 %s2633_s24, %s2332_s12  ;;  %s2062_s24 = scalar_lea.sflag [#allocation3], %s340_s16 }
 0x1b7   : > { %v1040_v18 = vsel %vm1028_vm4, %v3899_v42, %v644_v12  ;;  %v642_v54 = vpop.permute.xlu0 %641  ;;  %v1773_v42 = vrot.slane %v1771_v30, 1  ;;  %v1783_v53 = vshll.u32 %v1742_v21, 16  ;;  %v1781_v56 = vshrl.u32 %v1742_v21, 16 }
 0x1b8   : > { %v1038_v40 = vsel %vm1028_vm4, %v3902_v23, %v642_v54  ;;  %946 = vrot.lane.b32.xlu1 %v3824_v34, %s2665_s17  ;;  %v1769_v23 = vshrl.u32 %v1738_v11, 16  ;;  %v1780_v34 = vor.u32 %v1779_v52, %v1775_v19  ;;  %v1791_v22 = vrot.slane %v1789_v59, 1 }
 0x1b9   : > { %944 = vrot.lane.b32.xlu0 %v3828_v61, %s2665_s17  ;;  %v1785_v61 = vrot.slane %v1783_v53, 1  ;;  %vm1908_vm1 = vcmask 883712   ;;  %vm2050_vm3 = vcmask 58368  }
 0x1ba   : > { %v4042_v49 = vpop.permute.xlu1 %880  ;;  %v1774_v5 = vor.u32 %v1773_v42, %v1769_v23  ;;  %v1792_v28 = vor.u32 %v1791_v22, %v1787_v35 }
 0x1bb   : > { %v4044_v58 = vpop.permute.xlu0 %878  ;;  %v1786_v8 = vor.u32 %v1785_v61, %v1781_v56 }
 0x1bc   : > { %950 = vrot.lane.b32.xlu1 %v2293_v26, %s2665_s17 }
 0x1bd   : > { %948 = vrot.lane.b32.xlu0 %v3874_v20, %s2665_s17  ;;  %s2255_s17 = sshll.u32 %s380_s19, 3  ;;  %s2333_s19 = sshll.u32 %s2076_s9, 5 }
 0x1be   : > { %v903_v43 = vpop.permute.xlu1 %902  ;;  %s4152_s13 = scalar_lea.vmem %s4250_s5, %s2255_s17  ;;  %s342_s17 = scalar_lea.vmem [#allocation2], %s2249_s14 }
 0x1bf   : > { %v901_v51 = vpop.permute.xlu0 %900  ;;  %s2080_s20 = sshll.u32 %s342_s17, 4  ;;  %s4192_s18 = scalar_lea.hbm %s4251_s6, %s2333_s19  ;;  %s4194_s20 = int_to_ptr.vmem [resolvable:$true] %s2080_s20 }
 0x1c0   : > { %1803 = vrot.lane.b32.xlu1 %v1780_v34, %s2666_s29  ;;  %v1155_v34 = vsel %vm1147_vm12, %v3927_v45, %v4042_v49  ;;  %s2555_s25 = scalar_lea.vmem %s4194_s20, 32 }
 0x1c1   : > { %1801 = vrot.lane.b32.xlu0 %v1774_v5, %s2666_s29  ;;  %p2556_p4 = scmp.ne.s32.totalorder %s4194_s20, %s2555_s25 }
 0x1c2   : > { %v648_v17 = vpop.permute.xlu1 %647 }
 0x1c3   : > { %v1044_v60 = vsel %vm1028_vm4, %v1027_v31, %v648_v17  ;;  %v646_v1 = vpop.permute.xlu0 %645  ;;  %p2557_p5 = pnand %p2556_p4, %p2754_p3 }
 0x1c4   : > { %v1042_v20 = vsel %vm1028_vm4, %v1025_v16, %v646_v1  ;;  %1807 = vrot.lane.b32.xlu1 %v1792_v28, %s2666_s29 }
 0x1c5   : > { %1805 = vrot.lane.b32.xlu0 %v1786_v8, %s2666_s29  ;;  %p2558_p6 = pneg %p2557_p5 }
 0x1c6   : > { %v663_v38 = vpop.permute.xlu1 %662 }
 0x1c7   : > { %v1057_v27 = vsel %vm1045_vm5, %v1040_v18, %v663_v38  ;;  %v661_v13 = vpop.permute.xlu0 %660  ;;  %v1151_v18 = vsel %vm1147_vm12, %v3866_v0, %v3960_v39 }
 0x1c8   : > { %v1055_v14 = vsel %vm1045_vm5, %v1038_v40, %v661_v13  ;;  %v1168_v21 = vsel %vm1164_vm13, %v1151_v18, %v903_v43  ;;  %v1166_v40 = vsel %vm1164_vm13, %v1149_v55, %v901_v51  ;;  %v1153_v43 = vsel %vm1147_vm12, %v3937_v36, %v4044_v58 }
 0x1ca   : > { %v907_v32 = vpop.permute.xlu1 %906 }
 0x1cb   : > { %v905_v37 = vpop.permute.xlu0 %904  ;;  %v1172_v5 = vsel %vm1164_vm13, %v1155_v34, %v907_v32 }
 0x1cc   : > { %v1170_v61 = vsel %vm1164_vm13, %v1153_v43, %v905_v37 }
 0x1ce   : > { %v920_v46 = vpop.permute.xlu1 %919 }
 0x1cf   : > { %v918_v3 = vpop.permute.xlu0 %917  ;;  %v1185_v41 = vsel %vm1181_vm14, %v1168_v21, %v920_v46 }
 0x1d0   : > { %v1183_v26 = vsel %vm1181_vm14, %v1166_v40, %v918_v3 }
 0x1d2   : > { %v667_v15 = vpop.permute.xlu1 %666 }
 0x1d3   : > { %v1061_v31 = vsel %vm1045_vm5, %v1044_v60, %v667_v15  ;;  %v665_v29 = vpop.permute.xlu0 %664 }
 0x1d4   : > { %v1059_v33 = vsel %vm1045_vm5, %v1042_v20, %v665_v29 }
 0x1d6   : > { %v689_v11 = vpop.permute.xlu1 %688 }
 0x1d7   : > { %v1074_v16 = vsel %vm1062_vm6, %v1057_v27, %v689_v11  ;;  %v687_v57 = vpop.permute.xlu0 %686 }
 0x1d8   : > { %v1072_v62 = vsel %vm1062_vm6, %v1055_v14, %v687_v57 }
 0x1da   : > { %v924_v9 = vpop.permute.xlu1 %923 }
 0x1db   : > { %v922_v50 = vpop.permute.xlu0 %921  ;;  %v1189_v51 = vsel %vm1181_vm14, %v1172_v5, %v924_v9 }
 0x1dc   : > { %v1187_v35 = vsel %vm1181_vm14, %v1170_v61, %v922_v50 }
 0x1de   : > { %v939_v63 = vpop.permute.xlu1 %938 }
 0x1df   : > { %v937_v24 = vpop.permute.xlu0 %936  ;;  %v1202_v52 = vsel %vm1198_vm15, %v1185_v41, %v939_v63 }
 0x1e0   : > { %v1200_v0 = vsel %vm1198_vm15, %v1183_v26, %v937_v24 }
 0x1e2   : > { %v693_v44 = vpop.permute.xlu1 %692 }
 0x1e3   : > { %v4062_v6 = vsel %vm1062_vm6, %v1061_v31, %v693_v44  ;;  %v691_v2 = vpop.permute.xlu0 %690 }
 0x1e4   : > { %v4065_v12 = vsel %vm1062_vm6, %v1059_v33, %v691_v2 }
 0x1e6   : > { %v706_v4 = vpop.permute.xlu1 %705 }
 0x1e7   : > { %v4068_v48 = vsel %vm1079_vm7, %v1074_v16, %v706_v4  ;;  %v704_v30 = vpop.permute.xlu0 %703 }
 0x1e8   : > { %v4071_v10 = vsel %vm1079_vm7, %v1072_v62, %v704_v30 }
 0x1ea   : > { %v943_v7 = vpop.permute.xlu1 %942 }
 0x1eb   : > { %v941_v54 = vpop.permute.xlu0 %940  ;;  %v1206_v56 = vsel %vm1198_vm15, %v1189_v51, %v943_v7 }
 0x1ec   : > { %v1204_v17 = vsel %vm1198_vm15, %v1187_v35, %v941_v54 }
 0x1ee   : > { %v1796_v59 = vpop.permute.xlu1 %1795 }
 0x1ef   : > { %v1813_v39 = vsel %vm1809_vm0, %v1202_v52, %v1796_v59  ;;  %v1794_v42 = vpop.permute.xlu0 %1793 }
 0x1f0   : > { %v1811_v53 = vsel %vm1809_vm0, %v1200_v0, %v1794_v42 }
 0x1f1   : > { %v2316_v47 = vcombine.low %v1811_v53, %v1813_v39 }
 0x1f2   : > { %v710_v25 = vpop.permute.xlu1 %709 }
 0x1f3   : > { %2361 = vmatprep.mubr.msk.bf16.mxu0 %vm1908_vm1, %v2316_v47  ;;  %v708_v19 = vpop.permute.xlu0 %707  ;;  %v1095_v54 = vsel %vm1079_vm7, %v4062_v6, %v710_v25 }
 0x1f6   : > { %v746_v23 = vpop.permute.xlu1 %745 }
 0x1f7   : > { %v744_v22 = vpop.permute.xlu0 %743  ;;  %v1108_v44 = vsel %vm1096_vm8, %v4068_v48, %v746_v23  ;;  %v1093_v48 = vsel %vm1079_vm7, %v4065_v12, %v708_v19 }
 0x1f8   : > { %v1106_v2 = vsel %vm1096_vm8, %v4071_v10, %v744_v22 }
 0x1fa   : > { %v1800_v28 = vpop.permute.xlu1 %1799 }
 0x1fb   : > { %v1817_v45 = vsel %vm1809_vm0, %v1206_v56, %v1800_v28  ;;  %v1798_v49 = vpop.permute.xlu0 %1797 }
 0x1fc   : > { %v1815_v8 = vsel %vm1809_vm0, %v1204_v17, %v1798_v49 }
 0x1fd   : > { %v2317_v60 = vcombine.low %v1815_v8, %v1817_v45 }
 0x1fe   : > { %v750_v36 = vpop.permute.xlu1 %749 }
 0x1ff   : > { %2362 = vmatmul.mubr.msk.bf16.vlgmr.msra.gmra.mrb[0].mxu0 %vm1908_vm1, %v2317_v60  ;;  %v748_v58 = vpop.permute.xlu0 %747  ;;  %v1112_v10 = vsel %vm1096_vm8, %v1095_v54, %v750_v36 }
 0x200   : > { %v1110_v52 = vsel %vm1096_vm8, %v1093_v48, %v748_v58 }
 0x202   : > { %v842_v1 = vpop.permute.xlu1 %841 }
 0x203   : > { %v840_v20 = vpop.permute.xlu0 %839  ;;  %v1125_v4 = vsel %vm1113_vm9, %v1108_v44, %v842_v1  ;;  %v2315_v1 = vld [vmem:[%s4249_s4] ss:$0 sm:$0xff] }
 0x204   : > { %v1123_v30 = vsel %vm1113_vm9, %v1106_v2, %v840_v20 }
 0x206   : > { %v846_v38 = vpop.permute.xlu1 %845 }
 0x207   : > { %v844_v27 = vpop.permute.xlu0 %843  ;;  %v1129_v59 = vsel %vm1113_vm9, %v1112_v10, %v846_v38 }
 0x208   : > { %v1127_v39 = vsel %vm1113_vm9, %v1110_v52, %v844_v27 }
 0x20a   : > { %v866_v13 = vpop.permute.xlu1 %865 }
 0x20b   : > { %v864_v14 = vpop.permute.xlu0 %863  ;;  %v1142_v7 = vsel %vm1130_vm11, %v1125_v4, %v866_v13 }
 0x20c   : > { %v1140_v55 = vsel %vm1130_vm11, %v1123_v30, %v864_v14 }
 0x20e   : > { %v870_v32 = vpop.permute.xlu1 %869 }
 0x20f   : > { %v868_v37 = vpop.permute.xlu0 %867  ;;  %v1146_v42 = vsel %vm1130_vm11, %v1129_v59, %v870_v32 }
 0x210   : > { %v1144_v25 = vsel %vm1130_vm11, %v1127_v39, %v868_v37 }
 0x212   : > { %v885_v46 = vpop.permute.xlu1 %884 }
 0x213   : > { %v883_v3 = vpop.permute.xlu0 %882  ;;  %v1159_v21 = vsel %vm1147_vm12, %v1142_v7, %v885_v46 }
 0x214   : > { %v1157_v41 = vsel %vm1147_vm12, %v1140_v55, %v883_v3 }
 0x216   : > { %v889_v15 = vpop.permute.xlu1 %888 }
 0x217   : > { %v887_v31 = vpop.permute.xlu0 %886  ;;  %v1163_v19 = vsel %vm1147_vm12, %v1146_v42, %v889_v15 }
 0x218   : > { %v1161_v43 = vsel %vm1147_vm12, %v1144_v25, %v887_v31 }
 0x21a   : > { %v911_v29 = vpop.permute.xlu1 %910 }
 0x21b   : > { %v909_v33 = vpop.permute.xlu0 %908  ;;  %v1176_v26 = vsel %vm1164_vm13, %v1159_v21, %v911_v29 }
 0x21c   : > { %v1174_v6 = vsel %vm1164_vm13, %v1157_v41, %v909_v33 }
 0x21e   : > { %v915_v11 = vpop.permute.xlu1 %914 }
 0x21f   : > { %v913_v16 = vpop.permute.xlu0 %912  ;;  %v1180_v5 = vsel %vm1164_vm13, %v1163_v19, %v915_v11 }
 0x220   : > { %v1178_v51 = vsel %vm1164_vm13, %v1161_v43, %v913_v16 }
 0x222   : > { %v928_v57 = vpop.permute.xlu1 %927 }
 0x223   : > { %v926_v62 = vpop.permute.xlu0 %925  ;;  %v1193_v0 = vsel %vm1181_vm14, %v1176_v26, %v928_v57 }
 0x224   : > { %v1191_v12 = vsel %vm1181_vm14, %v1174_v6, %v926_v62 }
 0x226   : > { %v932_v9 = vpop.permute.xlu1 %931 }
 0x227   : > { %v930_v50 = vpop.permute.xlu0 %929  ;;  %v1197_v35 = vsel %vm1181_vm14, %v1180_v5, %v932_v9 }
 0x228   : > { %v1195_v28 = vsel %vm1181_vm14, %v1178_v51, %v930_v50 }
 0x22a   : > { %v947_v63 = vpop.permute.xlu1 %946 }
 0x22b   : > { %v945_v24 = vpop.permute.xlu0 %944  ;;  %v1210_v53 = vsel %vm1198_vm15, %v1193_v0, %v947_v63 }
 0x22c   : > { %v1208_v23 = vsel %vm1198_vm15, %v1191_v12, %v945_v24 }
 0x22e   : > { %v951_v18 = vpop.permute.xlu1 %950 }
 0x22f   : > { %v949_v40 = vpop.permute.xlu0 %948  ;;  %v1214_v17 = vsel %vm1198_vm15, %v1197_v35, %v951_v18 }
 0x230   : > { %v1212_v49 = vsel %vm1198_vm15, %v1195_v28, %v949_v40 }
 0x232   : > { %v1804_v47 = vpop.permute.xlu1 %1803 }
 0x233   : > { %v1821_v34 = vsel %vm1809_vm0, %v1210_v53, %v1804_v47  ;;  %v1802_v22 = vpop.permute.xlu0 %1801 }
 0x234   : > { %v1819_v61 = vsel %vm1809_vm0, %v1208_v23, %v1802_v22 }
 0x235   : > { %v2318_v56 = vcombine.low %v1819_v61, %v1821_v34 }
 0x236   : > { %v1808_v45 = vpop.permute.xlu1 %1807 }
 0x237   : > { %v1825_v8 = vsel %vm1809_vm0, %v1214_v17, %v1808_v45  ;;  %2365 = vmatprep.mubr.msk.bf16.mxu1 %vm1908_vm1, %v2318_v56  ;;  %v1806_v60 = vpop.permute.xlu0 %1805 }
 0x238   : > { %v1823_v36 = vsel %vm1809_vm0, %v1212_v49, %v1806_v60 }
 0x239   : > { %v2319_v58 = vcombine.low %v1823_v36, %v1825_v8 }
 0x23b   : > { %2366 = vmatmul.mubr.msk.bf16.vlgmr.msra.gmra.mrb[0].mxu1 %vm1908_vm1, %v2319_v58 }
 0x2d2   : > { %v2363_v20 = vpop.f32.mrb[0].mxu0 }
 0x2d3   : > { %v1968_v38 = vadd.f32 %v2363_v20, %v2315_v1  ;;  %v1959_v27 = vpop.f32.mrb[1].mxu0 }
 0x2d4   : > { %v1960_v13 = vadd.f32 %v2315_v1, %v1959_v27  ;;  %v2364_v14 = vpop.f32.mrb[2].mxu0 }
 0x2d5   : > { %1992 = vst.msk [vmem:[%s4152_s13 + $0x10] sm:$0xff] %vm977_vm2, %v1968_v38  ;;  %v1971_v32 = vadd.f32 %v2364_v14, %v2315_v1  ;;  %v1962_v37 = vpop.f32.mrb[3].mxu0  ;;  %v2021_v15 = vmul.f32 %v1968_v38, %v1968_v38  ;;  %v2001_v16 = vsel %vm977_vm2, %v1968_v38, 0.0 }
 0x2d6   : > { %1990 = vst.msk [vmem:[%s4152_s13] sm:$0xff] %vm977_vm2, %v1960_v13  ;;  %v2019_v46 = vmul.f32 %v1960_v13, %v1960_v13  ;;  %v1963_v3 = vadd.f32 %v2315_v1, %v1962_v37  ;;  %v1998_v31 = vsel %vm977_vm2, %v1960_v13, 0.0 }
 0x2d7   : > { %1993 = vst.msk [vmem:[%s4152_s13 + $0x18] sm:$0xff] %vm977_vm2, %v1971_v32  ;;  %v2022_v62 = vmul.f32 %v1971_v32, %v1971_v32  ;;  %v2030_v24 = vsel %vm977_vm2, %v2021_v15, 0.0  ;;  %v2003_v44 = vsel %vm977_vm2, %v1971_v32, 0.0 }
 0x2d8   : > { %1991 = vst.msk [vmem:[%s4152_s13 + $0x8] sm:$0xff] %vm977_vm2, %v1963_v3  ;;  %v1999_v29 = vsel %vm977_vm2, %v1963_v3, 0.0  ;;  %v2020_v33 = vmul.f32 %v1963_v3, %v1963_v3  ;;  %v2027_v57 = vsel %vm977_vm2, %v2019_v46, 0.0 }
 0x2d9   : > { %v2000_v11 = vadd.f32 %v1999_v29, %v1998_v31  ;;  %v2032_v30 = vsel %vm977_vm2, %v2022_v62, 0.0 }
 0x2da   : > { %v2028_v9 = vsel %vm977_vm2, %v2020_v33, 0.0 }
 0x2db   : > { %v2002_v50 = vadd.f32 %v2001_v16, %v2000_v11  ;;  %v2029_v63 = vadd.f32 %v2028_v9, %v2027_v57 }
 0x2dd   : > { %v2031_v2 = vadd.f32 %v2030_v24, %v2029_v63  ;;  %v2004_v4 = vadd.f32 %v2003_v44, %v2002_v50 }
 0x2df   : > { %v2033_v7 = vadd.f32 %v2032_v30, %v2031_v2 }
 0x30e   : > { %v2367_v18 = vpop.f32.mrb[0].mxu1 }
 0x30f   : > { %v1984_v54 = vadd.f32 %v2367_v18, %v2315_v1  ;;  %v1975_v55 = vpop.f32.mrb[1].mxu1 }
 0x310   : > { %v1976_v21 = vadd.f32 %v2315_v1, %v1975_v55  ;;  %v2368_v40 = vpop.f32.mrb[2].mxu1 }
 0x311   : > { %1996 = vst.msk [vmem:[%s4152_s13 + $0x30] sm:$0xff] %vm977_vm2, %v1984_v54  ;;  %v1987_v48 = vadd.f32 %v2368_v40, %v2315_v1  ;;  %v1978_v10 = vpop.f32.mrb[3].mxu1  ;;  %v2025_v6 = vmul.f32 %v1984_v54, %v1984_v54  ;;  %v2009_v47 = vsel %vm977_vm2, %v1984_v54, 0.0 }
 0x312   : > { %1994 = vst.msk [vmem:[%s4152_s13 + $0x20] sm:$0xff] %vm977_vm2, %v1976_v21  ;;  %v2005_v41 = vsel %vm977_vm2, %v1976_v21, 0.0  ;;  %v2023_v26 = vmul.f32 %v1976_v21, %v1976_v21  ;;  %v1979_v52 = vadd.f32 %v2315_v1, %v1978_v10 }
 0x313   : > { %v2006_v59 = vadd.f32 %v2005_v41, %v2004_v4  ;;  %1997 = vst.msk [vmem:[%s4152_s13 + $0x38] sm:$0xff] %vm977_vm2, %v1987_v48  ;;  %v2026_v25 = vmul.f32 %v1987_v48, %v1987_v48  ;;  %v2038_v22 = vsel %vm977_vm2, %v2025_v6, 0.0  ;;  %v2011_v43 = vsel %vm977_vm2, %v1987_v48, 0.0 }
 0x314   : > { %v2034_v0 = vsel %vm977_vm2, %v2023_v26, 0.0  ;;  %1995 = vst.msk [vmem:[%s4152_s13 + $0x28] sm:$0xff] %vm977_vm2, %v1979_v52  ;;  %v2007_v39 = vsel %vm977_vm2, %v1979_v52, 0.0  ;;  %v2024_v42 = vmul.f32 %v1979_v52, %v1979_v52  ;;  %s2667_s13 = smov [#allocation2]  }
 0x315   : > { %v2035_v12 = vadd.f32 %v2034_v0, %v2033_v7  ;;  %v2008_v53 = vadd.f32 %v2007_v39, %v2006_v59  ;;  %v2040_v51 = vsel %vm977_vm2, %v2026_v25, 0.0  ;;  %s2559_s14 = sshll.u32 %s2667_s13, 4  ;;  %s2560_s14 = int_to_ptr.vmem [resolvable:$false] %s2559_s14 }
 0x316   : > { %v2036_v19 = vsel %vm977_vm2, %v2024_v42, 0.0  ;;  %vm2048_vm2 = vcmask 1040384   ;;  %s2561_s12 = scalar_lea.vmem %s2560_s14, 64  ;;  %p2562_p7 = scmp.lt.s32.totalorder %s4194_s20, %s2560_s14 }
 0x317   : > { %v2010_v23 = vadd.f32 %v2009_v47, %v2008_v53  ;;  %v2037_v34 = vadd.f32 %v2036_v19, %v2035_v12  ;;  %p2563_p9 = scmp.lt.s32.totalorder %s2561_s12, %s2555_s25 }
 0x319   : > { %v2012_v5 = vadd.f32 %v2011_v43, %v2010_v23  ;;  %v2039_v61 = vadd.f32 %v2038_v22, %v2037_v34  ;;  %p2564_p10 = por %p2563_p9, %p2562_p7 }
 0x31b   : > { %v2013_v35 = vrot.slane %v2012_v5, 4  ;;  %v2041_v56 = vadd.f32 %v2040_v51, %v2039_v61  ;;  %p2565_p11 = pnand %p2564_p10, %p2558_p6 }
 0x31d   : > { %v2014_v28 = vadd.f32 %v2013_v35, %v2012_v5  ;;  %v2042_v17 = vrot.slane %v2041_v56, 4 }
 0x31f   : > { %v2015_v45 = vrot.slane %v2014_v28, 2  ;;  %v2043_v49 = vadd.f32 %v2042_v17, %v2041_v56 }
 0x321   : > { %v2016_v8 = vadd.f32 %v2015_v45, %v2014_v28  ;;  %v2044_v60 = vrot.slane %v2043_v49, 2 }
 0x323   : > { %v2017_v36 = vrot.slane %v2016_v8, 1  ;;  %v2045_v58 = vadd.f32 %v2044_v60, %v2043_v49 }
 0x325   : > { %v2046_v1 = vrot.slane %v2045_v58, 1  ;;  %v2018_v20 = vadd.f32 %v2017_v36, %v2016_v8 }
 0x327   : > { %v2047_v38 = vadd.f32 %v2046_v1, %v2045_v58 }
 0x329   : > { %v2049_v27 = vsel %vm2048_vm2, %v2018_v20, %v2047_v38 }
 0x32a   : > { %2051 = vst.msk [vmem:[%s342_s17] sm:$0x3] %vm2050_vm3, %v2049_v27 }
 0x32b   : > { %2568 = shalt.err (!%p2565_p11)
}
 0x32c   : > { %s2569_s16 = scalar_lea.hbm %s4192_s18, 32  ;;  %s2573_s17 = scalar_lea.hbm %s4251_s6, 512 }
 0x32d   : > { %p2570_p12 = scmp.ne.s32.totalorder %s4192_s18, %s2569_s16  ;;  %p2574_p1 = scmp.lt.u32.totalorder %s4192_s18, %s4251_s6 }
 0x32e   : > { %p2575_p2 = scmp.lt.u32.totalorder %s2573_s17, %s2569_s16  ;;  %p2577_p5 = scmp.lt.u32.totalorder %s2569_s16, %s4192_s18 }
 0x32f   : > { %p2571_p13 = pnand %p2570_p12, %p2754_p3 }
 0x330   : > { %p2576_p4 = por %p2575_p2, %p2574_p1 }
 0x331   : > { %p2572_p0 = pneg %p2571_p13 }
 0x332   : > { %p2578_p6 = por %p2577_p5, %p2576_p4 }
 0x334   : > { %p2579_p7 = pnand %p2578_p6, %p2572_p0 }
 0x336   : > { %2582 = shalt.err (!%p2579_p7)
}
 0x337   : > { %2389 = dma.vmem_to_hbm [thread:$0]  (%p2754_p3), %s4194_s20, 32, %s4192_s18, %s2062_s24  }
 0x338 PF: > { %p2395_p9 = scmp.ge.s32.totalorder %s2649_s28, 2  ;;  %s2104_s25 = sand.u32 1, %s2621_s21  }
 0x339   : > { %s2105_s13 = scalar_lea.sflag [#allocation3], %s2104_s25 }
 0x33a   : > { %p2392_p10 = pnand %p2395_p9, %p2763_p8 }
 0x33c   : > { %2616 = dma.done.wait (!%p2392_p10), %s2105_s13, 32  }
 0x33d   : > { %2618 = vsyncadd (!%p2392_p10), %s2105_s13, 4294967264  ;;  %s20_s28 = sadd.s32 1, %s2649_s28   ;;  %s4434_s21 = smov %s2625_s22 }
 0x33e   : > { %p17_p11 = scmp.ge.s32.totalorder %s20_s28, 18   ;;  %s4435_s22 = smov %s2629_s23 }
 0x33f   : > { %s4436_s23 = smov %s2772_s15  ;;  %s4437_s24 = smov %s2641_s26 }
 0x340   : > { %s4438_s25 = smov %s2645_s27  ;;  %s4439_s26 = smov %s4442_s7 }
 0x341   : > { %s4440_s27 = smov %s4446_s8  ;;  %19 = sbr.rel (!%p17_p11) target bundleno = 5 (0x5), region = 93 }
 0x348   :  { %2110 = vsyncpa [#allocation3], 1 }
 0x349   :  { %2112 = vsyncpa [#allocation3 + $0x1], 1 }

</bundles_post_ra>
